<compile_context>
chip_gen: v7x
topology: tpu7x:2x2x1
jax: 0.10.0
libtpu: 0.0.40
codegen_flags: <defaults>
</compile_context>

<pallas_src>
import jax
import jax.numpy as jnp
from jax.experimental import pallas as pl
from jax.experimental.pallas import tpu as pltpu


# ----------------------------- Pallas kernel ---------------------------------

def cvae_kernel(
    xin_ref,
    enc_w1_ref, enc_b1_ref,
    enc_w2_ref, enc_b2_ref,
    head_w_ref, head_b_ref,
    dec_w1z_ref, dec_w1c_ref, dec_b1_ref,
    dec_w2_ref, dec_b2_ref,
    dec_w3_ref, dec_b3_ref,
    out_ref,
):
    cond_dim = dec_w1c_ref.shape[0]
    latent_dim = dec_w1z_ref.shape[0]
    enc_in_dim = enc_w1_ref.shape[0]          # cond_dim + input_dim
    output_dim = dec_b3_ref.shape[1]
    two_lat = head_b_ref.shape[1]             # 2 * latent_dim
    lane = out_ref.shape[1] // 2              # 128-aligned region per result

    xin = xin_ref[...]                        # (TB, cond + input + latent), f32
    cond = xin[:, :cond_dim]                  # zero-offset lane slice
    enc_in = xin[:, :enc_in_dim]              # [cond | control]; enc_w1 rows pre-reordered
    eps = xin[:, enc_in_dim:]                 # (TB, latent), stays f32

    def mm(a, w_ref):
        # Cast only the MXU operands (weights already stored in matmul dtype by wrapper);
        # accumulate in f32. Elementwise work stays f32 for v5e's VPU/EUP.
        return jnp.dot(a.astype(w_ref.dtype), w_ref[...],
                       preferred_element_type=jnp.float32)

    # ---- encoder: Linear -> ReLU -> Linear -> ReLU ----
    h = jnp.maximum(mm(enc_in, enc_w1_ref) + enc_b1_ref[...], 0.0)
    h = jnp.maximum(mm(h, enc_w2_ref) + enc_b2_ref[...], 0.0)

    # ---- fused mu/logvar heads: single (H, 2*latent) matmul ----
    heads = mm(h, head_w_ref) + head_b_ref[...]
    mu = heads[:, :latent_dim]
    logvar = heads[:, latent_dim:]

    # ---- reparameterize in f32: z = mu + eps * exp(0.5 * logvar) ----
    z = mu + eps * jnp.exp(0.5 * logvar)

    # ---- decoder: [z, cond] concat realized as a split matmul (z only exists in-kernel) ----
    d = mm(z, dec_w1z_ref) + mm(cond, dec_w1c_ref) + dec_b1_ref[...]
    d = jnp.maximum(d, 0.0)
    d = jnp.maximum(mm(d, dec_w2_ref) + dec_b2_ref[...], 0.0)
    treated = mm(d, dec_w3_ref) + dec_b3_ref[...]

    # ---- lane-dense output: zero-pad each result to a full 128-lane region, then do
    #      full-width stores at vreg-aligned offsets (0 and `lane`) — no masked vst.msk,
    #      no mid-lane shifts, one output DMA per tile.
    tb = treated.shape[0]
    if output_dim < lane:
        treated = jnp.concatenate(
            [treated, jnp.zeros((tb, lane - output_dim), jnp.float32)], axis=1)
    if two_lat < lane:
        heads = jnp.concatenate(
            [heads, jnp.zeros((tb, lane - two_lat), jnp.float32)], axis=1)
    out_ref[:, :lane] = treated
    out_ref[:, lane:] = heads


# ----------------------------- wrapper ----------------------------------------

def _round_up(x, m):
    return ((x + m - 1) // m) * m


def cvae_forward(control_emb, drug_emb, logdose, eps, params, *,
                 batch_tile=512, matmul_dtype=jnp.bfloat16):
    """Pallas CVAE forward. Returns (treated_emb, mu, logvar), all float32."""
    B = control_emb.shape[0]
    input_dim = control_emb.shape[1]
    latent_dim = eps.shape[1]
    hidden_dim = params["enc_b1"].shape[1]
    output_dim = params["dec_b3"].shape[1]

    # ---- glue: conditioning vector + ONE lane-packed input [cond | control | eps] ----
    cond = jnp.concatenate([drug_emb, logdose[:, None]], axis=-1)      # (B, cond_dim)
    cond_dim = cond.shape[1]
    xin = jnp.concatenate([cond, control_emb, eps], axis=-1)           # (B, C + I + L)
    in_feat = cond_dim + input_dim + latent_dim

    # Encoder layer-1 expects [control | cond]; reorder its rows to match the packed
    # [cond | control] prefix so the kernel needs no in-kernel concat / lane shuffle.
    enc_w1 = jnp.concatenate(
        [params["enc_w1"][input_dim:], params["enc_w1"][:input_dim]], axis=0)

    # Fuse mu/logvar heads into one (H, 2*latent) weight / (1, 2*latent) bias.
    head_w = jnp.concatenate([params["mu_w"], params["lv_w"]], axis=1)
    head_b = jnp.concatenate([params["mu_b"], params["lv_b"]], axis=1)

    # Decoder layer-1 weight split (z is produced inside the kernel).
    dec_w1z, dec_w1c = params["dec_w1"][:latent_dim], params["dec_w1"][latent_dim:]

    # ---- batch tiling: big tiles to amortize per-step overhead / MXU fill, but keep
    #      >= 2 tiles when possible so v7x's two TensorCores both get work. ----
    TB = min(batch_tile, _round_up(-(-B // 2), 8))
    TB = max(TB, 8)
    Bp = _round_up(B, TB)
    if Bp != B:
        xin = jnp.pad(xin, ((0, Bp - B), (0, 0)))
    n_tiles = Bp // TB

    # ---- lane-dense packed output: two 128-aligned regions, one DMA stream ----
    lane = _round_up(max(output_dim, 2 * latent_dim), 128)
    out_width = 2 * lane

    # MXU operands in matmul_dtype (bf16 by default); biases stay f32 (elementwise add).
    mdt = jnp.dtype(matmul_dtype)
    weights = [
        enc_w1.astype(mdt), params["enc_b1"],
        params["enc_w2"].astype(mdt), params["enc_b2"],
        head_w.astype(mdt), head_b,
        dec_w1z.astype(mdt), dec_w1c.astype(mdt), params["dec_b1"],
        params["dec_w2"].astype(mdt), params["dec_b2"],
        params["dec_w3"].astype(mdt), params["dec_b3"],
    ]

    def batch_spec(feat):
        return pl.BlockSpec((TB, feat), lambda i: (i, 0))

    def resident_spec(arr):
        # Constant block index => not re-fetched between consecutive grid steps.
        # TODO(synk): pipeline_mode=pl.Buffered(1) would also drop the redundant second
        # buffer for these resident weights; marginal win, left out for portability.
        return pl.BlockSpec(arr.shape, lambda i: (0, 0))

    in_specs = [batch_spec(in_feat)] + [resident_spec(w) for w in weights]
    out_spec = pl.BlockSpec((TB, out_width), lambda i: (i, 0))

    # Advisory cost estimate so XLA schedules the surrounding glue ops sensibly.
    flops_per_row = 2 * (
        (input_dim + cond_dim) * hidden_dim
        + hidden_dim * hidden_dim
        + hidden_dim * 2 * latent_dim
        + (latent_dim + cond_dim) * hidden_dim
        + hidden_dim * hidden_dim
        + hidden_dim * output_dim
    )
    weight_bytes = sum(int(w.size) * w.dtype.itemsize for w in weights)
    bytes_accessed = int(Bp) * 4 * (in_feat + out_width) + weight_bytes
    cost = pl.CostEstimate(
        flops=int(flops_per_row) * int(Bp),
        transcendentals=int(Bp) * int(latent_dim),
        bytes_accessed=int(bytes_accessed),
    )

    packed = pl.pallas_call(
        cvae_kernel,
        out_shape=jax.ShapeDtypeStruct((Bp, out_width), jnp.float32),
        grid=(n_tiles,),
        in_specs=in_specs,
        out_specs=out_spec,
        compiler_params=pltpu.CompilerParams(dimension_semantics=("parallel",)),
        cost_estimate=cost,
    )(xin, *weights)

    packed = packed[:B]
    treated = packed[:, :output_dim]
    mu = packed[:, lane:lane + latent_dim]
    logvar = packed[:, lane + latent_dim:lane + 2 * latent_dim]
    return treated, mu, logvar


# ----------------------------- param init -------------------------------------

def init_params(key, input_dim, cond_dim, latent_dim, output_dim, hidden_dim):
    """Deterministic synthetic init. Weights stored as (in, out) = PyTorch W.T."""
    def linear(key, fan_in, fan_out):
        kw, kb = jax.random.split(key)
        bound = 1.0 / jnp.sqrt(fan_in)
        w = jax.random.uniform(kw, (fan_in, fan_out), jnp.float32, -bound, bound)
        b = jax.random.uniform(kb, (1, fan_out), jnp.float32, -bound, bound)
        return w, b

    keys = jax.random.split(key, 8)
    p = {}
    p["enc_w1"], p["enc_b1"] = linear(keys[0], input_dim + cond_dim, hidden_dim)
    p["enc_w2"], p["enc_b2"] = linear(keys[1], hidden_dim, hidden_dim)
    p["mu_w"], p["mu_b"] = linear(keys[2], hidden_dim, latent_dim)
    p["lv_w"], p["lv_b"] = linear(keys[3], hidden_dim, latent_dim)
    p["dec_w1"], p["dec_b1"] = linear(keys[4], latent_dim + cond_dim, hidden_dim)
    p["dec_w2"], p["dec_b2"] = linear(keys[5], hidden_dim, hidden_dim)
    p["dec_w3"], p["dec_b3"] = linear(keys[6], hidden_dim, output_dim)
    return p


# ----------------------------- reference (pure JAX) ----------------------------

def cvae_reference(control_emb, drug_emb, logdose, eps, params,
                   matmul_dtype=jnp.float32):
    dt = jnp.dtype(matmul_dtype)

    def mm(a, w):
        return jnp.dot(a.astype(dt), w.astype(dt),
                       preferred_element_type=jnp.float32,
                       precision=jax.lax.Precision.HIGHEST)

    cond = jnp.concatenate([drug_emb, logdose[:, None]], axis=-1)
    x = jnp.concatenate([control_emb, cond], axis=-1)
    h = jnp.maximum(mm(x, params["enc_w1"]) + params["enc_b1"], 0.0)
    h = jnp.maximum(mm(h, params["enc_w2"]) + params["enc_b2"], 0.0)
    mu = mm(h, params["mu_w"]) + params["mu_b"]
    logvar = mm(h, params["lv_w"]) + params["lv_b"]
    z = mu + eps * jnp.exp(0.5 * logvar)
    xd = jnp.concatenate([z, cond], axis=-1)
    d = jnp.maximum(mm(xd, params["dec_w1"]) + params["dec_b1"], 0.0)
    d = jnp.maximum(mm(d, params["dec_w2"]) + params["dec_b2"], 0.0)
    treated = mm(d, params["dec_w3"]) + params["dec_b3"]
    return treated, mu, logvar


# ----------------------------- main --------------------------------------------

if __name__ == "__main__":
    B = 256              # 2 batch tiles of 128 -> exercises the parallel grid
    input_dim = 32       # control_emb dim
    drug_dim = 15        # drug_emb dim
    cond_dim = drug_dim + 1
    latent_dim = 8
    output_dim = 32      # treated_emb dim
    hidden_dim = 32

    key = jax.random.PRNGKey(0)
    k_ctrl, k_drug, k_dose, k_eps, k_params = jax.random.split(key, 5)

    control_emb = jax.random.normal(k_ctrl, (B, input_dim), jnp.float32)
    drug_emb = jax.random.normal(k_drug, (B, drug_dim), jnp.float32)
    logdose = jax.random.normal(k_dose, (B,), jnp.float32)
    # Reparameterization noise (torch.randn_like equivalent), generated deterministically.
    eps = jax.random.normal(k_eps, (B, latent_dim), jnp.float32)

    params = init_params(k_params, input_dim, cond_dim, latent_dim, output_dim, hidden_dim)

    ref_treated, ref_mu, ref_logvar = cvae_reference(
        control_emb, drug_emb, logdose, eps, params)

    # ---- exact-semantics path: f32 MXU operands, tight check ----
    t32, m32, lv32 = cvae_forward(control_emb, drug_emb, logdose, eps, params,
                                  matmul_dtype=jnp.float32)
    jax.block_until_ready((t32, m32, lv32))
    assert t32.shape == (B, output_dim)
    assert m32.shape == (B, latent_dim)
    assert lv32.shape == (B, latent_dim)
    assert jnp.allclose(t32, ref_treated, atol=1e-3, rtol=1e-3)
    assert jnp.allclose(m32, ref_mu, atol=1e-3, rtol=1e-3)
    assert jnp.allclose(lv32, ref_logvar, atol=1e-3, rtol=1e-3)

    # ---- perf default: bf16 MXU operands, f32 accumulation & elementwise ----
    tb, mb, lvb = cvae_forward(control_emb, drug_emb, logdose, eps, params)
    jax.block_until_ready((tb, mb, lvb))
    assert tb.shape == (B, output_dim)
    assert jnp.allclose(tb, ref_treated, atol=1e-1, rtol=1e-1)
    assert jnp.allclose(mb, ref_mu, atol=1e-1, rtol=1e-1)
    assert jnp.allclose(lvb, ref_logvar, atol=1e-1, rtol=1e-1)

    print("KERNEL_OK")
</pallas_src>

<mosaic_0001>
module attributes {stable_mosaic.version = 11 : i64} {
  func.func @cvae_kernel(%arg0: i32, %arg1: memref<128x56xf32, #tpu.memory_space<vmem>>, %arg2: memref<48x32xf32, #tpu.memory_space<vmem>>, %arg3: memref<1x32xf32, #tpu.memory_space<vmem>>, %arg4: memref<32x32xf32, #tpu.memory_space<vmem>>, %arg5: memref<1x32xf32, #tpu.memory_space<vmem>>, %arg6: memref<32x16xf32, #tpu.memory_space<vmem>>, %arg7: memref<1x16xf32, #tpu.memory_space<vmem>>, %arg8: memref<8x32xf32, #tpu.memory_space<vmem>>, %arg9: memref<16x32xf32, #tpu.memory_space<vmem>>, %arg10: memref<1x32xf32, #tpu.memory_space<vmem>>, %arg11: memref<32x32xf32, #tpu.memory_space<vmem>>, %arg12: memref<1x32xf32, #tpu.memory_space<vmem>>, %arg13: memref<32x32xf32, #tpu.memory_space<vmem>>, %arg14: memref<1x32xf32, #tpu.memory_space<vmem>>, %arg15: memref<128x256xf32, #tpu.memory_space<vmem>>) attributes {dimension_semantics = [#tpu.dimension_semantics<parallel>], iteration_bounds = array<i64: 2>, scalar_prefetch = 0 : i64, scratch_operands = 0 : i64, tpu.core_type = #tpu.core_type<tc>, window_params = [{transform_indices = @transform_0, window_bounds = array<i64: 128, 56>}, {pipeline_mode = #tpu.pipeline_mode<synchronous>, transform_indices = @transform_1, window_bounds = array<i64: 48, 32>}, {pipeline_mode = #tpu.pipeline_mode<synchronous>, transform_indices = @transform_2, window_bounds = array<i64: 1, 32>}, {pipeline_mode = #tpu.pipeline_mode<synchronous>, transform_indices = @transform_3, window_bounds = array<i64: 32, 32>}, {pipeline_mode = #tpu.pipeline_mode<synchronous>, transform_indices = @transform_4, window_bounds = array<i64: 1, 32>}, {pipeline_mode = #tpu.pipeline_mode<synchronous>, transform_indices = @transform_5, window_bounds = array<i64: 32, 16>}, {pipeline_mode = #tpu.pipeline_mode<synchronous>, transform_indices = @transform_6, window_bounds = array<i64: 1, 16>}, {pipeline_mode = #tpu.pipeline_mode<synchronous>, transform_indices = @transform_7, window_bounds = array<i64: 8, 32>}, {pipeline_mode = #tpu.pipeline_mode<synchronous>, transform_indices = @transform_8, window_bounds = array<i64: 16, 32>}, {pipeline_mode = #tpu.pipeline_mode<synchronous>, transform_indices = @transform_9, window_bounds = array<i64: 1, 32>}, {pipeline_mode = #tpu.pipeline_mode<synchronous>, transform_indices = @transform_10, window_bounds = array<i64: 32, 32>}, {pipeline_mode = #tpu.pipeline_mode<synchronous>, transform_indices = @transform_11, window_bounds = array<i64: 1, 32>}, {pipeline_mode = #tpu.pipeline_mode<synchronous>, transform_indices = @transform_12, window_bounds = array<i64: 32, 32>}, {pipeline_mode = #tpu.pipeline_mode<synchronous>, transform_indices = @transform_13, window_bounds = array<i64: 1, 32>}, {transform_indices = @transform_14, window_bounds = array<i64: 128, 256>}]} {
    %c0 = arith.constant 0 : index
    %c0_0 = arith.constant 0 : index
    %0 = vector.load %arg1[%c0, %c0_0] : memref<128x56xf32, #tpu.memory_space<vmem>>, vector<128x56xf32>
    %1 = vector.extract_strided_slice %0 {offsets = [0, 0], sizes = [128, 16], strides = [1, 1]} : vector<128x56xf32> to vector<128x16xf32>
    %2 = vector.extract_strided_slice %0 {offsets = [0, 0], sizes = [128, 48], strides = [1, 1]} : vector<128x56xf32> to vector<128x48xf32>
    %3 = vector.extract_strided_slice %0 {offsets = [0, 48], sizes = [128, 8], strides = [1, 1]} : vector<128x56xf32> to vector<128x8xf32>
    %c0_1 = arith.constant 0 : index
    %c0_2 = arith.constant 0 : index
    %4 = vector.load %arg2[%c0_1, %c0_2] : memref<48x32xf32, #tpu.memory_space<vmem>>, vector<48x32xf32>
    %cst = arith.constant dense<0.000000e+00> : vector<128x32xf32>
    %5 = tpu.matmul %2, %4, %cst {dimension_numbers = #tpu.dot_dimension_numbers<[1], [0], [0], [1], [0, 0, 1, 1], [], []>} : vector<128x48xf32>, vector<48x32xf32>, vector<128x32xf32> -> vector<128x32xf32>
    %c0_3 = arith.constant 0 : index
    %c0_4 = arith.constant 0 : index
    %6 = vector.load %arg3[%c0_3, %c0_4] : memref<1x32xf32, #tpu.memory_space<vmem>>, vector<1x32xf32>
    %7 = vector.broadcast %6 : vector<1x32xf32> to vector<128x32xf32>
    %8 = arith.addf %5, %7 : vector<128x32xf32>
    %cst_5 = arith.constant 0.000000e+00 : f32
    %9 = vector.broadcast %cst_5 : f32 to vector<128x32xf32>
    %10 = arith.maximumf %8, %9 : vector<128x32xf32>
    %c0_6 = arith.constant 0 : index
    %c0_7 = arith.constant 0 : index
    %11 = vector.load %arg4[%c0_6, %c0_7] : memref<32x32xf32, #tpu.memory_space<vmem>>, vector<32x32xf32>
    %cst_8 = arith.constant dense<0.000000e+00> : vector<128x32xf32>
    %12 = tpu.matmul %10, %11, %cst_8 {dimension_numbers = #tpu.dot_dimension_numbers<[1], [0], [0], [1], [0, 0, 1, 1], [], []>} : vector<128x32xf32>, vector<32x32xf32>, vector<128x32xf32> -> vector<128x32xf32>
    %c0_9 = arith.constant 0 : index
    %c0_10 = arith.constant 0 : index
    %13 = vector.load %arg5[%c0_9, %c0_10] : memref<1x32xf32, #tpu.memory_space<vmem>>, vector<1x32xf32>
    %14 = vector.broadcast %13 : vector<1x32xf32> to vector<128x32xf32>
    %15 = arith.addf %12, %14 : vector<128x32xf32>
    %cst_11 = arith.constant 0.000000e+00 : f32
    %16 = vector.broadcast %cst_11 : f32 to vector<128x32xf32>
    %17 = arith.maximumf %15, %16 : vector<128x32xf32>
    %c0_12 = arith.constant 0 : index
    %c0_13 = arith.constant 0 : index
    %18 = vector.load %arg6[%c0_12, %c0_13] : memref<32x16xf32, #tpu.memory_space<vmem>>, vector<32x16xf32>
    %cst_14 = arith.constant dense<0.000000e+00> : vector<128x16xf32>
    %19 = tpu.matmul %17, %18, %cst_14 {dimension_numbers = #tpu.dot_dimension_numbers<[1], [0], [0], [1], [0, 0, 1, 1], [], []>} : vector<128x32xf32>, vector<32x16xf32>, vector<128x16xf32> -> vector<128x16xf32>
    %c0_15 = arith.constant 0 : index
    %c0_16 = arith.constant 0 : index
    %20 = vector.load %arg7[%c0_15, %c0_16] : memref<1x16xf32, #tpu.memory_space<vmem>>, vector<1x16xf32>
    %21 = vector.broadcast %20 : vector<1x16xf32> to vector<128x16xf32>
    %22 = arith.addf %19, %21 : vector<128x16xf32>
    %23 = vector.extract_strided_slice %22 {offsets = [0, 0], sizes = [128, 8], strides = [1, 1]} : vector<128x16xf32> to vector<128x8xf32>
    %24 = vector.extract_strided_slice %22 {offsets = [0, 8], sizes = [128, 8], strides = [1, 1]} : vector<128x16xf32> to vector<128x8xf32>
    %cst_17 = arith.constant 5.000000e-01 : f32
    %25 = vector.broadcast %cst_17 : f32 to vector<128x8xf32>
    %26 = arith.mulf %25, %24 : vector<128x8xf32>
    %27 = math.exp %26 : vector<128x8xf32>
    %28 = arith.mulf %3, %27 : vector<128x8xf32>
    %29 = arith.addf %23, %28 : vector<128x8xf32>
    %c0_18 = arith.constant 0 : index
    %c0_19 = arith.constant 0 : index
    %30 = vector.load %arg8[%c0_18, %c0_19] : memref<8x32xf32, #tpu.memory_space<vmem>>, vector<8x32xf32>
    %cst_20 = arith.constant dense<0.000000e+00> : vector<128x32xf32>
    %31 = tpu.matmul %29, %30, %cst_20 {dimension_numbers = #tpu.dot_dimension_numbers<[1], [0], [0], [1], [0, 0, 1, 1], [], []>} : vector<128x8xf32>, vector<8x32xf32>, vector<128x32xf32> -> vector<128x32xf32>
    %c0_21 = arith.constant 0 : index
    %c0_22 = arith.constant 0 : index
    %32 = vector.load %arg9[%c0_21, %c0_22] : memref<16x32xf32, #tpu.memory_space<vmem>>, vector<16x32xf32>
    %cst_23 = arith.constant dense<0.000000e+00> : vector<128x32xf32>
    %33 = tpu.matmul %1, %32, %cst_23 {dimension_numbers = #tpu.dot_dimension_numbers<[1], [0], [0], [1], [0, 0, 1, 1], [], []>} : vector<128x16xf32>, vector<16x32xf32>, vector<128x32xf32> -> vector<128x32xf32>
    %34 = arith.addf %31, %33 : vector<128x32xf32>
    %c0_24 = arith.constant 0 : index
    %c0_25 = arith.constant 0 : index
    %35 = vector.load %arg10[%c0_24, %c0_25] : memref<1x32xf32, #tpu.memory_space<vmem>>, vector<1x32xf32>
    %36 = vector.broadcast %35 : vector<1x32xf32> to vector<128x32xf32>
    %37 = arith.addf %34, %36 : vector<128x32xf32>
    %cst_26 = arith.constant 0.000000e+00 : f32
    %38 = vector.broadcast %cst_26 : f32 to vector<128x32xf32>
    %39 = arith.maximumf %37, %38 : vector<128x32xf32>
    %c0_27 = arith.constant 0 : index
    %c0_28 = arith.constant 0 : index
    %40 = vector.load %arg11[%c0_27, %c0_28] : memref<32x32xf32, #tpu.memory_space<vmem>>, vector<32x32xf32>
    %cst_29 = arith.constant dense<0.000000e+00> : vector<128x32xf32>
    %41 = tpu.matmul %39, %40, %cst_29 {dimension_numbers = #tpu.dot_dimension_numbers<[1], [0], [0], [1], [0, 0, 1, 1], [], []>} : vector<128x32xf32>, vector<32x32xf32>, vector<128x32xf32> -> vector<128x32xf32>
    %c0_30 = arith.constant 0 : index
    %c0_31 = arith.constant 0 : index
    %42 = vector.load %arg12[%c0_30, %c0_31] : memref<1x32xf32, #tpu.memory_space<vmem>>, vector<1x32xf32>
    %43 = vector.broadcast %42 : vector<1x32xf32> to vector<128x32xf32>
    %44 = arith.addf %41, %43 : vector<128x32xf32>
    %cst_32 = arith.constant 0.000000e+00 : f32
    %45 = vector.broadcast %cst_32 : f32 to vector<128x32xf32>
    %46 = arith.maximumf %44, %45 : vector<128x32xf32>
    %c0_33 = arith.constant 0 : index
    %c0_34 = arith.constant 0 : index
    %47 = vector.load %arg13[%c0_33, %c0_34] : memref<32x32xf32, #tpu.memory_space<vmem>>, vector<32x32xf32>
    %cst_35 = arith.constant dense<0.000000e+00> : vector<128x32xf32>
    %48 = tpu.matmul %46, %47, %cst_35 {dimension_numbers = #tpu.dot_dimension_numbers<[1], [0], [0], [1], [0, 0, 1, 1], [], []>} : vector<128x32xf32>, vector<32x32xf32>, vector<128x32xf32> -> vector<128x32xf32>
    %c0_36 = arith.constant 0 : index
    %c0_37 = arith.constant 0 : index
    %49 = vector.load %arg14[%c0_36, %c0_37] : memref<1x32xf32, #tpu.memory_space<vmem>>, vector<1x32xf32>
    %50 = vector.broadcast %49 : vector<1x32xf32> to vector<128x32xf32>
    %51 = arith.addf %48, %50 : vector<128x32xf32>
    %cst_38 = arith.constant 0.000000e+00 : f32
    %52 = vector.broadcast %cst_38 : f32 to vector<128x96xf32>
    %53 = tpu.concatenate %51, %52 in 1 : vector<128x32xf32>, vector<128x96xf32> -> vector<128x128xf32>
    %cst_39 = arith.constant 0.000000e+00 : f32
    %54 = vector.broadcast %cst_39 : f32 to vector<128x112xf32>
    %55 = tpu.concatenate %22, %54 in 1 : vector<128x16xf32>, vector<128x112xf32> -> vector<128x128xf32>
    %c0_40 = arith.constant 0 : index
    %c0_41 = arith.constant 0 : index
    %56 = vector.load %arg15[%c0_40, %c0_41] : memref<128x256xf32, #tpu.memory_space<vmem>>, vector<128x128xf32>
    tpu.vector_store %arg15[%c0_40, %c0_41], %53 {strides = array<i32>} : memref<128x256xf32, #tpu.memory_space<vmem>>, vector<128x128xf32>,
    %c0_42 = arith.constant 0 : index
    %c128 = arith.constant 128 : index
    %57 = vector.load %arg15[%c0_42, %c128] : memref<128x256xf32, #tpu.memory_space<vmem>>, vector<128x128xf32>
    tpu.vector_store %arg15[%c0_42, %c128], %55 {strides = array<i32>} : memref<128x256xf32, #tpu.memory_space<vmem>>, vector<128x128xf32>,
    return
  }
  func.func @transform_0(%arg0: i32) -> (i32, i32) {
    %c0_i32 = arith.constant 0 : i32
    %c0_i32_0 = arith.constant 0 : i32
    return %arg0, %c0_i32 : i32, i32
  }
  func.func @transform_1(%arg0: i32) -> (i32, i32) {
    %c0_i32 = arith.constant 0 : i32
    %c0_i32_0 = arith.constant 0 : i32
    %c0_i32_1 = arith.constant 0 : i32
    return %c0_i32, %c0_i32_0 : i32, i32
  }
  func.func @transform_2(%arg0: i32) -> (i32, i32) {
    %c0_i32 = arith.constant 0 : i32
    %c0_i32_0 = arith.constant 0 : i32
    %c0_i32_1 = arith.constant 0 : i32
    return %c0_i32, %c0_i32_0 : i32, i32
  }
  func.func @transform_3(%arg0: i32) -> (i32, i32) {
    %c0_i32 = arith.constant 0 : i32
    %c0_i32_0 = arith.constant 0 : i32
    %c0_i32_1 = arith.constant 0 : i32
    return %c0_i32, %c0_i32_0 : i32, i32
  }
  func.func @transform_4(%arg0: i32) -> (i32, i32) {
    %c0_i32 = arith.constant 0 : i32
    %c0_i32_0 = arith.constant 0 : i32
    %c0_i32_1 = arith.constant 0 : i32
    return %c0_i32, %c0_i32_0 : i32, i32
  }
  func.func @transform_5(%arg0: i32) -> (i32, i32) {
    %c0_i32 = arith.constant 0 : i32
    %c0_i32_0 = arith.constant 0 : i32
    %c0_i32_1 = arith.constant 0 : i32
    return %c0_i32, %c0_i32_0 : i32, i32
  }
  func.func @transform_6(%arg0: i32) -> (i32, i32) {
    %c0_i32 = arith.constant 0 : i32
    %c0_i32_0 = arith.constant 0 : i32
    %c0_i32_1 = arith.constant 0 : i32
    return %c0_i32, %c0_i32_0 : i32, i32
  }
  func.func @transform_7(%arg0: i32) -> (i32, i32) {
    %c0_i32 = arith.constant 0 : i32
    %c0_i32_0 = arith.constant 0 : i32
    %c0_i32_1 = arith.constant 0 : i32
    return %c0_i32, %c0_i32_0 : i32, i32
  }
  func.func @transform_8(%arg0: i32) -> (i32, i32) {
    %c0_i32 = arith.constant 0 : i32
    %c0_i32_0 = arith.constant 0 : i32
    %c0_i32_1 = arith.constant 0 : i32
    return %c0_i32, %c0_i32_0 : i32, i32
  }
  func.func @transform_9(%arg0: i32) -> (i32, i32) {
    %c0_i32 = arith.constant 0 : i32
    %c0_i32_0 = arith.constant 0 : i32
    %c0_i32_1 = arith.constant 0 : i32
    return %c0_i32, %c0_i32_0 : i32, i32
  }
  func.func @transform_10(%arg0: i32) -> (i32, i32) {
    %c0_i32 = arith.constant 0 : i32
    %c0_i32_0 = arith.constant 0 : i32
    %c0_i32_1 = arith.constant 0 : i32
    return %c0_i32, %c0_i32_0 : i32, i32
  }
  func.func @transform_11(%arg0: i32) -> (i32, i32) {
    %c0_i32 = arith.constant 0 : i32
    %c0_i32_0 = arith.constant 0 : i32
    %c0_i32_1 = arith.constant 0 : i32
    return %c0_i32, %c0_i32_0 : i32, i32
  }
  func.func @transform_12(%arg0: i32) -> (i32, i32) {
    %c0_i32 = arith.constant 0 : i32
    %c0_i32_0 = arith.constant 0 : i32
    %c0_i32_1 = arith.constant 0 : i32
    return %c0_i32, %c0_i32_0 : i32, i32
  }
  func.func @transform_13(%arg0: i32) -> (i32, i32) {
    %c0_i32 = arith.constant 0 : i32
    %c0_i32_0 = arith.constant 0 : i32
    %c0_i32_1 = arith.constant 0 : i32
    return %c0_i32, %c0_i32_0 : i32, i32
  }
  func.func @transform_14(%arg0: i32) -> (i32, i32) {
    %c0_i32 = arith.constant 0 : i32
    %c0_i32_0 = arith.constant 0 : i32
    return %arg0, %c0_i32 : i32, i32
  }
}

</mosaic_0001>

<bundles_post_ra>
// kernel: tpu_custom_call.1
= control target key start
LH: loop header
LB: loop body
LE: loop exit
PB: predicated region body
PF: predicated region fallthrough
CT: control target
= control target key end

     0   :  { %19 = vsyncpa [#allocation3], 0  ;;  %s3737_s0 = inlined_call_operand.vmem [shape: f32[256,56], index: 0, kind: input, shape index: {}]   ;;  %s3738_s1 = inlined_call_operand.vmem [shape: f32[48,32], index: 1, kind: input, shape index: {}]   ;;  %s3739_s2 = inlined_call_operand.vmem [shape: f32[1,32], index: 2, kind: input, shape index: {}]   ;;  %s3740_s3 = inlined_call_operand.vmem [shape: f32[32,32], index: 3, kind: input, shape index: {}]   ;;  %s3741_s4 = inlined_call_operand.vmem [shape: f32[1,32], index: 4, kind: input, shape index: {}]   ;;  %s3742_s5 = inlined_call_operand.vmem [shape: f32[32,16], index: 5, kind: input, shape index: {}]   ;;  %s3743_s6 = inlined_call_operand.vmem [shape: f32[1,16], index: 6, kind: input, shape index: {}]   ;;  %s3744_s7 = inlined_call_operand.vmem [shape: f32[8,32], index: 7, kind: input, shape index: {}]   ;;  %s3745_s8 = inlined_call_operand.vmem [shape: f32[16,32], index: 8, kind: input, shape index: {}]   ;;  %s3746_s9 = inlined_call_operand.vmem [shape: f32[1,32], index: 9, kind: input, shape index: {}]   ;;  %s3747_s10 = inlined_call_operand.vmem [shape: f32[32,32], index: 10, kind: input, shape index: {}]   ;;  %s3748_s11 = inlined_call_operand.vmem [shape: f32[1,32], index: 11, kind: input, shape index: {}]   ;;  %s3749_s12 = inlined_call_operand.vmem [shape: f32[32,32], index: 12, kind: input, shape index: {}]   ;;  %s3750_s13 = inlined_call_operand.vmem [shape: f32[1,32], index: 13, kind: input, shape index: {}]   ;;  %s3751_s14 = inlined_call_operand.hbm [shape: f32[256,256], index: 14, kind: output, shape index: {}]  }
   0x1   :  { %21 = vsyncpa [#allocation3 + $0x1], 0  ;;  %s3095_s29 = smov 0   ;;  %s3097_s30 = smov 0  }
   0x2   :  { %s3099_s15 = smov 0   ;;  %s3101_s16 = smov 0  }
   0x3 LB: > { %3756 = sst [smem:[#allocation5_spill]] %s3009_s15  ;;  %s3116_s17 = sadd.s32 4294967295, %s3013_s16   ;;  %s3013_s16 = sphi %s3101_s16, %s3763_s16   ;;  %s3009_s15 = sphi %s3099_s15, %s3765_s15   ;;  %s3005_s30 = sphi %s3097_s30, %s3767_s30   ;;  %s3001_s29 = sphi %s3095_s29, %s3766_s29  }
   0x4   : > { %s2320_s18 = sadd.s32 4294967294, %s3013_s16   ;;  %s3120_s19 = sadd.s32 1, %s3013_s16  }
   0x5   : > { %3757 = sst [smem:[#allocation6_spill]] %s3120_s19  ;;  %s333_s20 = sadd.s32 1, %s3009_s15 }
   0x6   : > { %s330_s21 = ssub.s32 %s3013_s16, %s3120_s19  ;;  %p343_p0 = scmp.ne.s32.totalorder %s3009_s15, %s3005_s30 }
   0x7   : > { %p331_p1 = scmp.eq.s32.totalorder %s330_s21, 0  ;;  %p344_p2 = scmp.eq.s32.totalorder %s3116_s17, 1 }
   0x8   : > { %p349_p3 = scmp.ne.s32.totalorder %s3005_s30, %s3001_s29  ;;  %p350_p4 = scmp.eq.s32.totalorder %s2320_s18, 1 }
   0x9   : > { %s3131_s22 = scalar_select %p331_p1, %s3009_s15, %s333_s20  }
   0xa   : > { %p3133_p5 = por %p344_p2, %p343_p0  ;;  %p3137_p6 = por %p350_p4, %p349_p3 }
   0xb   : > { %3758 = sst [smem:[#allocation7_spill]] %s3131_s22  ;;  %p2323_p7 = scmp.ge.s32.totalorder %s3013_s16, 1 }
   0xc   : > { %s3760_s24 = scalar_select %p3137_p6, 1, 0 }
   0xd   : > { %p416_p8 = scmp.lt.s32.totalorder %s3013_s16, 3 }
   0xe   : > { %3761 = sst [smem:[#allocation8_spill]] %s3760_s24 }
   0xf   : > { %p417_p9 = pnand %p2323_p7, %p416_p8 }
  0x10   : > { %v485_v0 = vld [vmem:[%s3738_s1] sm:$0xff] (!%p417_p9)  ;;  %v486_v1 = vld [vmem:[%s3738_s1 + $0x8] sm:$0xff] (!%p417_p9)  ;;  %v487_v2 = vld [vmem:[%s3738_s1 + $0x10] sm:$0xff] (!%p417_p9)  ;;  %s2325_s21 = sshll.u32 (!%p417_p9), %s3116_s17, 4  ;;  %vm498_vm0 = vcmask (!%p417_p9), 392192   ;;  %vm719_vm1 = vcmask (!%p417_p9), 261120  }
  0x11   : > { %420 = sbr.rel (%p417_p9) target bundleno = 1630 (0x65e), region = 76  ;;  %v2808_v3 = vpack.c.bf16 (!%p417_p9), %v486_v1, %v485_v0  ;;  %v488_v4 = vld [vmem:[%s3738_s1 + $0x18] sm:$0xff] (!%p417_p9)  ;;  %v489_v5 = vld [vmem:[%s3738_s1 + $0x20] sm:$0xff] (!%p417_p9)  ;;  %v490_v6 = vld [vmem:[%s3738_s1 + $0x28] sm:$0xff] (!%p417_p9)  ;;  %p463_p10 = scmp.lt.s32.totalorder (!%p417_p9), %s2325_s21, 31  ;;  %vm1344_vm2 = vcmask (!%p417_p9), 130048  }
  0x12   : > { %v2812_v7 = vpack.c.bf16 (!%p417_p9), %v488_v4, %v487_v2  ;;  %v708_v8 = vld [vmem:[%s3740_s3] sm:$0xff] (!%p417_p9)  ;;  %v709_v9 = vld [vmem:[%s3740_s3 + $0x8] sm:$0xff] (!%p417_p9)  ;;  %v710_v10 = vld [vmem:[%s3740_s3 + $0x10] sm:$0xff] (!%p417_p9)  ;;  %v2816_v13 = vpack.c.bf16 (!%p417_p9), %v490_v6, %v489_v5  ;;  %s459_s18 = sand.u32 (!%p417_p9), 1, %s3005_s30   ;;  %s3015_s24 = smov (!%p417_p9), 40   ;;  %vm1522_vm3 = vcmask (!%p417_p9), 64512  }
  0x13   : > { %2809 = vmatprep.subr.bf16.mxu0 (!%p417_p9), %v2808_v3  ;;  %v2820_v11 = vpack.c.bf16 (!%p417_p9), %v709_v9, %v708_v8  ;;  %v711_v12 = vld [vmem:[%s3740_s3 + $0x18] sm:$0xff] (!%p417_p9)  ;;  %v929_v31 = vld [vmem:[%s3742_s5] sm:$0xff] (!%p417_p9)  ;;  %v930_v32 = vld [vmem:[%s3742_s5 + $0x8] sm:$0xff] (!%p417_p9)  ;;  %s2324_s20 = sshll.u32 (!%p417_p9), %s459_s18, 8  ;;  %s3016_s15 = smov (!%p417_p9), 80  }
  0x14   : > { %2811 = vmatpush3.bf16.msra.mxu0 (!%p417_p9), %v2808_v3  ;;  %v2824_v14 = vpack.c.bf16 (!%p417_p9), %v711_v12, %v710_v10  ;;  %v2828_v33 = vpack.c.bf16 (!%p417_p9), %v930_v32, %v929_v31  ;;  %v3268_v34 = vld [vmem:[%s3739_s2] ss:$0 sm:$0xff] (!%p417_p9)  ;;  %v931_v57 = vld [vmem:[%s3742_s5 + $0x10] sm:$0xff] (!%p417_p9)  ;;  %v932_v58 = vld [vmem:[%s3742_s5 + $0x18] sm:$0xff] (!%p417_p9)  ;;  %s3346_s19 = scalar_lea.vmem (!%p417_p9), [#allocation2], %s2324_s20  ;;  %s2452_s27 = sshll.u32 (!%p417_p9), %s3116_s17, 12 }
  0x15   : > { %2813 = vmatprep.subr.bf16.mxu0 (!%p417_p9), %v2812_v7  ;;  %2856 = vmatprep.subr.bf16.mxu1 (!%p417_p9), %v2820_v11  ;;  %v2832_v0 = vpack.c.bf16 (!%p417_p9), %v932_v58, %v931_v57  ;;  %s3696_s17 = scalar_lea.sflag (!%p417_p9), [#allocation3], %s459_s18 }
  0x16   : > { %2858 = vmatpush3.bf16.msra.mxu1 (!%p417_p9), %v2820_v11 }
  0x17   : > { %2857 = vmatprep.subr.bf16.mxu1 (!%p417_p9), %v2824_v14 }
  0x18   : > { %s3769_s21 = smov (!%p463_p10, %s2325_s21), 31  ;;  %2815 = vmatpush3.bf16.msra.mxu0 %v2812_v7 }
  0x19   : > { %s2326_s25 = sshll.u32 %s3769_s21, 3  ;;  %2817 = vmatprep.subr.bf16.mxu0 %v2816_v13 }
  0x1a   : > { %s3177_s28 = scalar_lea.vmem %s3737_s0, %s2326_s25  ;;  %2859 = vmatpush3.bf16.msra.mxu1 %v2824_v14 }
  0x1b   : > { %v3180_v15 = vld [vmem:[%s3177_s28] sm:$0xff]  ;;  %v3185_v16 = vld [vmem:[%s3177_s28 + $0x8] sm:$0xff]  ;;  %v3188_v17 = vld [vmem:[%s3177_s28 + $0x10] sm:$0xff]  ;;  %2829 = vmatprep.subr.bf16.mxu1 %v2828_v33 }
  0x1c   : > { %2602 = vmatprep.mubr.msk.f32.mxu0 %vm498_vm0, %v3180_v15  ;;  %2819 = vmatpush3.bf16.msra.mxu0 %v2816_v13  ;;  %v3195_v18 = vld [vmem:[%s3177_s28 + $0x18] sm:$0xff]  ;;  %v3198_v19 = vld [vmem:[%s3177_s28 + $0x20] sm:$0xff]  ;;  %v3205_v20 = vld [vmem:[%s3177_s28 + $0x28] sm:$0xff] }
  0x1d   : > { %2821 = vmatprep.subr.bf16.mxu0 %v2820_v11  ;;  %v3208_v21 = vld [vmem:[%s3177_s28 + $0x30] sm:$0xff]  ;;  %v3215_v22 = vld [vmem:[%s3177_s28 + $0x38] sm:$0xff]  ;;  %v3218_v23 = vld [vmem:[%s3177_s28 + $0x40] sm:$0xff] }
  0x1e   : > { %v3225_v24 = vld [vmem:[%s3177_s28 + $0x48] sm:$0xff]  ;;  %v3228_v25 = vld [vmem:[%s3177_s28 + $0x50] sm:$0xff]  ;;  %v3235_v26 = vld [vmem:[%s3177_s28 + $0x58] sm:$0xff] }
  0x1f   : > { %2603 = vmatmul.mubr.msk.f32.vlgmr.msra.gmra.mrb[0].mxu0 %vm498_vm0, %v3185_v16  ;;  %v3238_v27 = vld [vmem:[%s3177_s28 + $0x60] sm:$0xff]  ;;  %v3245_v28 = vld [vmem:[%s3177_s28 + $0x68] sm:$0xff]  ;;  %v3248_v29 = vld [vmem:[%s3177_s28 + $0x70] sm:$0xff] }
  0x20   : > { %2605 = vmatprep.mubr.msk.f32.mxu0 %vm498_vm0, %v3188_v17  ;;  %2823 = vmatpush3.bf16.msra.mxu0 %v2820_v11  ;;  %v3255_v30 = vld [vmem:[%s3177_s28 + $0x78] sm:$0xff]  ;;  %s2258_s28 = sshll.u32 %s3346_s19, 4  ;;  %s3688_s28 = int_to_ptr.vmem [resolvable:$true] %s2258_s28 }
  0x21   : > { %2825 = vmatprep.subr.bf16.mxu0 %v2824_v14  ;;  %s2951_s22 = scalar_lea.vmem %s3688_s28, 4096 }
  0x22   : > { %p2952_p11 = scmp.ne.s32.totalorder %s3688_s28, %s2951_s22 }
  0x23   : > { %2606 = vmatmul.mubr.msk.f32.gmra.mrb[2].mxu0 %vm498_vm0, %v3195_v18 }
  0x24   : > { %2608 = vmatprep.mubr.msk.f32.mxu0 %vm498_vm0, %v3198_v19  ;;  %2827 = vmatpush3.bf16.msra.mxu0 %v2824_v14  ;;  %p2953_p12 = pnand %p2952_p11, %p3133_p5 }
  0x26   : > { %p2954_p13 = pneg %p2953_p12 }
  0x27   : > { %2609 = vmatmul.mubr.msk.f32.gmra.mrb[4].mxu0 %vm498_vm0, %v3205_v20 }
  0x28   : > { %2611 = vmatprep.mubr.msk.f32.mxu0 %vm498_vm0, %v3208_v21 }
  0x2b   : > { %2612 = vmatmul.mubr.msk.f32.gmra.mrb[6].mxu0 %vm498_vm0, %v3215_v22 }
  0x2c   : > { %2614 = vmatprep.mubr.msk.f32.mxu0 %vm498_vm0, %v3218_v23 }
  0x2f   : > { %2615 = vmatmul.mubr.msk.f32.gmra.mrb[8].mxu0 %vm498_vm0, %v3225_v24 }
  0x30   : > { %2617 = vmatprep.mubr.msk.f32.mxu0 %vm498_vm0, %v3228_v25 }
  0x33   : > { %2618 = vmatmul.mubr.msk.f32.gmra.mrb[10].mxu0 %vm498_vm0, %v3235_v26 }
  0x34   : > { %2620 = vmatprep.mubr.msk.f32.mxu0 %vm498_vm0, %v3238_v27 }
  0x37   : > { %2621 = vmatmul.mubr.msk.f32.gmra.mrb[12].mxu0 %vm498_vm0, %v3245_v28 }
  0x38   : > { %2623 = vmatprep.mubr.msk.f32.mxu0 %vm498_vm0, %v3248_v29 }
  0x3b   : > { %2624 = vmatmul.mubr.msk.f32.gmra.mrb[14].mxu0 %vm498_vm0, %v3255_v30 }
  0xf2   : > { %v2604_v35 = vpop.f32.mrb[0].mxu0 }
  0xf3   : > { %v619_v36 = vadd.f32 %v2604_v35, %v3268_v34  ;;  %v613_v37 = vpop.f32.mrb[1].mxu0 }
  0xf4   : > { %v614_v38 = vadd.f32 %v3268_v34, %v613_v37 }
  0xf5   : > { %v693_v41 = vmax.f32 %v619_v36, 0.0 }
  0xf6   : > { %v692_v39 = vmax.f32 %v614_v38, 0.0  ;;  %v2607_v40 = vpop.f32.mrb[2].mxu0 }
  0xf7   : > { %v629_v42 = vadd.f32 %v2607_v40, %v3268_v34  ;;  %v623_v43 = vpop.f32.mrb[3].mxu0 }
  0xf8   : > { %v624_v44 = vadd.f32 %v3268_v34, %v623_v43  ;;  %2634 = vmatprep.mubr.msk.f32.mxu0 %vm719_vm1, %v692_v39  ;;  %v2344_v39 = vld [vmem:[%s3741_s4] ss:$0 sm:$0xff] }
  0xf9   : > { %2635 = vmatmul.mubr.msk.f32.vlgmr.msra.gmra.mrb[16].mxu0 %vm719_vm1, %v693_v41  ;;  %v695_v47 = vmax.f32 %v629_v42, 0.0 }
  0xfa   : > { %v694_v45 = vmax.f32 %v624_v44, 0.0  ;;  %v2610_v46 = vpop.f32.mrb[4].mxu0 }
  0xfb   : > { %v639_v48 = vadd.f32 %v2610_v46, %v3268_v34  ;;  %v633_v49 = vpop.f32.mrb[5].mxu0 }
  0xfc   : > { %v634_v50 = vadd.f32 %v3268_v34, %v633_v49  ;;  %2637 = vmatprep.mubr.msk.f32.mxu0 %vm719_vm1, %v694_v45 }
  0xfd   : > { %v697_v51 = vmax.f32 %v639_v48, 0.0  ;;  %2638 = vmatmul.mubr.msk.f32.gmra.mrb[18].mxu0 %vm719_vm1, %v695_v47 }
  0xfe   : > { %v696_v52 = vmax.f32 %v634_v50, 0.0  ;;  %v2613_v53 = vpop.f32.mrb[6].mxu0 }
  0xff   : > { %v649_v54 = vadd.f32 %v2613_v53, %v3268_v34  ;;  %v643_v55 = vpop.f32.mrb[7].mxu0 }
 0x100   : > { %v644_v56 = vadd.f32 %v3268_v34, %v643_v55  ;;  %2640 = vmatprep.mubr.msk.f32.mxu0 %vm719_vm1, %v696_v52 }
 0x101   : > { %v699_v59 = vmax.f32 %v649_v54, 0.0  ;;  %2641 = vmatmul.mubr.msk.f32.gmra.mrb[20].mxu0 %vm719_vm1, %v697_v51 }
 0x102   : > { %v698_v60 = vmax.f32 %v644_v56, 0.0  ;;  %v2616_v61 = vpop.f32.mrb[8].mxu0  ;;  %2694 = vmatprep.mubr.msk.f32.mxu0 %vm1344_vm2, %v3180_v15 }
 0x103   : > { %v659_v62 = vadd.f32 %v2616_v61, %v3268_v34  ;;  %v653_v63 = vpop.f32.mrb[9].mxu0 }
 0x104   : > { %v654_v1 = vadd.f32 %v3268_v34, %v653_v63  ;;  %2643 = vmatprep.mubr.msk.f32.mxu1 %vm719_vm1, %v698_v60 }
 0x105   : > { %v701_v2 = vmax.f32 %v659_v62, 0.0  ;;  %2644 = vmatmul.mubr.msk.f32.vlgmr.msra.gmra.mrb[0].mxu1 %vm719_vm1, %v699_v59 }
 0x106   : > { %v700_v3 = vmax.f32 %v654_v1, 0.0  ;;  %v2619_v4 = vpop.f32.mrb[10].mxu0  ;;  %2831 = vmatpush3.bf16.msra.mxu1 %v2828_v33 }
 0x107   : > { %v669_v5 = vadd.f32 %v2619_v4, %v3268_v34  ;;  %v663_v6 = vpop.f32.mrb[11].mxu0  ;;  %2833 = vmatprep.subr.bf16.mxu1 %v2832_v0 }
 0x108   : > { %v664_v7 = vadd.f32 %v3268_v34, %v663_v6  ;;  %2646 = vmatprep.mubr.msk.f32.mxu1 %vm719_vm1, %v700_v3 }
 0x109   : > { %v703_v8 = vmax.f32 %v669_v5, 0.0  ;;  %2647 = vmatmul.mubr.msk.f32.gmra.mrb[2].mxu1 %vm719_vm1, %v701_v2 }
 0x10a   : > { %v702_v9 = vmax.f32 %v664_v7, 0.0  ;;  %v2622_v10 = vpop.f32.mrb[12].mxu0  ;;  %2835 = vmatpush3.bf16.msra.mxu1 %v2832_v0 }
 0x10b   : > { %v679_v11 = vadd.f32 %v2622_v10, %v3268_v34  ;;  %v673_v12 = vpop.f32.mrb[13].mxu0 }
 0x10c   : > { %v674_v13 = vadd.f32 %v3268_v34, %v673_v12  ;;  %2649 = vmatprep.mubr.msk.f32.mxu1 %vm719_vm1, %v702_v9 }
 0x10d   : > { %v705_v14 = vmax.f32 %v679_v11, 0.0  ;;  %2650 = vmatmul.mubr.msk.f32.gmra.mrb[4].mxu1 %vm719_vm1, %v703_v8 }
 0x10e   : > { %v704_v31 = vmax.f32 %v674_v13, 0.0  ;;  %v2625_v32 = vpop.f32.mrb[14].mxu0 }
 0x10f   : > { %v689_v33 = vadd.f32 %v2625_v32, %v3268_v34  ;;  %v683_v35 = vpop.f32.mrb[15].mxu0 }
 0x110   : > { %v684_v36 = vadd.f32 %v3268_v34, %v683_v35  ;;  %2652 = vmatprep.mubr.msk.f32.mxu1 %vm719_vm1, %v704_v31 }
 0x111   : > { %v707_v37 = vmax.f32 %v689_v33, 0.0  ;;  %2653 = vmatmul.mubr.msk.f32.gmra.mrb[6].mxu1 %vm719_vm1, %v705_v14 }
 0x112   : > { %v706_v38 = vmax.f32 %v684_v36, 0.0 }
 0x114   : > { %2655 = vmatprep.mubr.msk.f32.mxu1 %vm719_vm1, %v706_v38 }
 0x115   : > { %2656 = vmatmul.mubr.msk.f32.gmra.mrb[8].mxu1 %vm719_vm1, %v707_v37 }
 0x1cc   : > { %v2636_v40 = vpop.f32.mrb[16].mxu0 }
 0x1cd   : > { %v840_v41 = vadd.f32 %v2636_v40, %v2344_v39  ;;  %v834_v42 = vpop.f32.mrb[17].mxu0 }
 0x1ce   : > { %v835_v43 = vadd.f32 %v2344_v39, %v834_v42 }
 0x1cf   : > { %v914_v45 = vmax.f32 %v840_v41, 0.0 }
 0x1d0   : > { %v913_v44 = vmax.f32 %v835_v43, 0.0  ;;  %v2639_v34 = vpop.f32.mrb[18].mxu0 }
 0x1d1   : > { %v850_v46 = vadd.f32 %v2639_v34, %v2344_v39  ;;  %v844_v47 = vpop.f32.mrb[19].mxu0 }
 0x1d2   : > { %v845_v48 = vadd.f32 %v2344_v39, %v844_v47  ;;  %2666 = vmatprep.mubr.msk.f32.mxu1 %vm719_vm1, %v913_v44 }
 0x1d3   : > { %2667 = vmatmul.mubr.msk.f32.vlgmr.msra.gmra.mrb[10].mxu1 %vm719_vm1, %v914_v45  ;;  %v916_v51 = vmax.f32 %v850_v46, 0.0 }
 0x1d4   : > { %v915_v49 = vmax.f32 %v845_v48, 0.0  ;;  %v2642_v50 = vpop.f32.mrb[20].mxu0 }
 0x1d5   : > { %v860_v52 = vadd.f32 %v2642_v50, %v2344_v39  ;;  %v854_v53 = vpop.f32.mrb[21].mxu0 }
 0x1d6   : > { %v855_v54 = vadd.f32 %v2344_v39, %v854_v53  ;;  %2669 = vmatprep.mubr.msk.f32.mxu1 %vm719_vm1, %v915_v49 }
 0x1d7   : > { %v918_v55 = vmax.f32 %v860_v52, 0.0  ;;  %2670 = vmatmul.mubr.msk.f32.gmra.mrb[12].mxu1 %vm719_vm1, %v916_v51 }
 0x1d8   : > { %v917_v56 = vmax.f32 %v855_v54, 0.0  ;;  %v2645_v57 = vpop.f32.mrb[0].mxu1 }
 0x1d9   : > { %v870_v58 = vadd.f32 %v2645_v57, %v2344_v39  ;;  %v864_v59 = vpop.f32.mrb[1].mxu1 }
 0x1da   : > { %v865_v60 = vadd.f32 %v2344_v39, %v864_v59  ;;  %2672 = vmatprep.mubr.msk.f32.mxu1 %vm719_vm1, %v917_v56 }
 0x1db   : > { %v920_v61 = vmax.f32 %v870_v58, 0.0  ;;  %2673 = vmatmul.mubr.msk.f32.gmra.mrb[14].mxu1 %vm719_vm1, %v918_v55 }
 0x1dc   : > { %v919_v62 = vmax.f32 %v865_v60, 0.0  ;;  %v2648_v63 = vpop.f32.mrb[2].mxu1 }
 0x1dd   : > { %v880_v0 = vadd.f32 %v2648_v63, %v2344_v39  ;;  %v874_v1 = vpop.f32.mrb[3].mxu1 }
 0x1de   : > { %v875_v2 = vadd.f32 %v2344_v39, %v874_v1  ;;  %2675 = vmatprep.mubr.msk.f32.mxu1 %vm719_vm1, %v919_v62 }
 0x1df   : > { %v922_v3 = vmax.f32 %v880_v0, 0.0  ;;  %2676 = vmatmul.mubr.msk.f32.gmra.mrb[16].mxu1 %vm719_vm1, %v920_v61 }
 0x1e0   : > { %v921_v4 = vmax.f32 %v875_v2, 0.0  ;;  %v2651_v5 = vpop.f32.mrb[4].mxu1 }
 0x1e1   : > { %v890_v6 = vadd.f32 %v2651_v5, %v2344_v39  ;;  %v884_v7 = vpop.f32.mrb[5].mxu1 }
 0x1e2   : > { %v885_v8 = vadd.f32 %v2344_v39, %v884_v7  ;;  %2678 = vmatprep.mubr.msk.f32.mxu1 %vm719_vm1, %v921_v4 }
 0x1e3   : > { %v924_v9 = vmax.f32 %v890_v6, 0.0  ;;  %2679 = vmatmul.mubr.msk.f32.gmra.mrb[18].mxu1 %vm719_vm1, %v922_v3 }
 0x1e4   : > { %v923_v10 = vmax.f32 %v885_v8, 0.0  ;;  %v2654_v11 = vpop.f32.mrb[6].mxu1 }
 0x1e5   : > { %v900_v12 = vadd.f32 %v2654_v11, %v2344_v39  ;;  %v894_v13 = vpop.f32.mrb[7].mxu1 }
 0x1e6   : > { %v895_v14 = vadd.f32 %v2344_v39, %v894_v13  ;;  %2681 = vmatprep.mubr.msk.f32.mxu1 %vm719_vm1, %v923_v10 }
 0x1e7   : > { %v926_v31 = vmax.f32 %v900_v12, 0.0  ;;  %2682 = vmatmul.mubr.msk.f32.gmra.mrb[20].mxu1 %vm719_vm1, %v924_v9 }
 0x1e8   : > { %v925_v32 = vmax.f32 %v895_v14, 0.0  ;;  %v2657_v33 = vpop.f32.mrb[8].mxu1 }
 0x1e9   : > { %v910_v35 = vadd.f32 %v2657_v33, %v2344_v39  ;;  %v904_v36 = vpop.f32.mrb[9].mxu1 }
 0x1ea   : > { %v905_v37 = vadd.f32 %v2344_v39, %v904_v36  ;;  %2684 = vmatprep.mubr.msk.f32.mxu1 %vm719_vm1, %v925_v32  ;;  %v3335_v39 = vld [vmem:[%s3743_s6] ss:$0 sm:$0xff] }
 0x1eb   : > { %v928_v38 = vmax.f32 %v910_v35, 0.0  ;;  %2685 = vmatmul.mubr.msk.f32.gmra.mrb[22].mxu1 %vm719_vm1, %v926_v31 }
 0x1ec   : > { %v927_v40 = vmax.f32 %v905_v37, 0.0 }
 0x1ee   : > { %2687 = vmatprep.mubr.msk.f32.mxu1 %vm719_vm1, %v927_v40 }
 0x1ef   : > { %2688 = vmatmul.mubr.msk.f32.gmra.mrb[24].mxu1 %vm719_vm1, %v928_v38 }
 0x2a6   : > { %v2668_v41 = vpop.f32.mrb[10].mxu1 }
 0x2a7   : > { %v3338_v42 = vadd.f32 %v2668_v41, %v3335_v39  ;;  %v1054_v43 = vpop.f32.mrb[11].mxu1 }
 0x2a8   : > { %v3341_v44 = vadd.f32 %v3335_v39, %v1054_v43 }
 0x2a9   : > { %v1134_v34 = vmul.f32 0.5, %v3338_v42  ;;  %v2196_v45 = vsel %vm1344_vm2, %v3338_v42, 0.0 }
 0x2aa   : > { %2228 = vst [vmem:[%s3346_s19 + $0x18] sm:$0xff] %v2196_v45  ;;  %v1133_v46 = vmul.f32 0.5, %v3341_v44  ;;  %v2195_v47 = vsel %vm1344_vm2, %v3341_v44, 0.0  ;;  %v2671_v48 = vpop.f32.mrb[12].mxu1 }
 0x2ab   : > { %2227 = vst [vmem:[%s3346_s19 + $0x8] sm:$0xff] %v2195_v47  ;;  %v3354_v49 = vadd.f32 %v2671_v48, %v3335_v39  ;;  %v1064_v50 = vpop.f32.mrb[13].mxu1  ;;  %v1151_v53 = vmul.f32 1.442695, %v1134_v34 }
 0x2ac   : > { %v1149_v51 = vmul.f32 1.442695, %v1133_v46  ;;  %v3357_v52 = vadd.f32 %v3335_v39, %v1064_v50 }
 0x2ad   : > { %v1136_v54 = vmul.f32 0.5, %v3354_v49  ;;  %v2198_v55 = vsel %vm1344_vm2, %v3354_v49, 0.0 }
 0x2ae   : > { %2919 = vpow2.f32 %v1149_v51  ;;  %2230 = vst [vmem:[%s3346_s19 + $0x38] sm:$0xff] %v2198_v55  ;;  %v1135_v56 = vmul.f32 0.5, %v3357_v52  ;;  %v2197_v57 = vsel %vm1344_vm2, %v3357_v52, 0.0  ;;  %v2674_v58 = vpop.f32.mrb[14].mxu1 }
 0x2af   : > { %2229 = vst [vmem:[%s3346_s19 + $0x28] sm:$0xff] %v2197_v57  ;;  %v3368_v59 = vadd.f32 %v2674_v58, %v3335_v39  ;;  %v1074_v60 = vpop.f32.mrb[15].mxu1  ;;  %2921 = vpow2.f32 %v1151_v53  ;;  %v1155_v63 = vmul.f32 1.442695, %v1136_v54 }
 0x2b0   : > { %v1153_v61 = vmul.f32 1.442695, %v1135_v56  ;;  %v3371_v62 = vadd.f32 %v3335_v39, %v1074_v60 }
 0x2b1   : > { %v1138_v0 = vmul.f32 0.5, %v3368_v59  ;;  %v2200_v1 = vsel %vm1344_vm2, %v3368_v59, 0.0 }
 0x2b2   : > { %2923 = vpow2.f32 %v1153_v61  ;;  %2232 = vst [vmem:[%s3346_s19 + $0x58] sm:$0xff] %v2200_v1  ;;  %v1137_v2 = vmul.f32 0.5, %v3371_v62  ;;  %v2199_v3 = vsel %vm1344_vm2, %v3371_v62, 0.0  ;;  %v2677_v4 = vpop.f32.mrb[16].mxu1 }
 0x2b3   : > { %2231 = vst [vmem:[%s3346_s19 + $0x48] sm:$0xff] %v2199_v3  ;;  %v3382_v5 = vadd.f32 %v2677_v4, %v3335_v39  ;;  %v1084_v6 = vpop.f32.mrb[17].mxu1  ;;  %2925 = vpow2.f32 %v1155_v63  ;;  %v1159_v9 = vmul.f32 1.442695, %v1138_v0 }
 0x2b4   : > { %v1157_v7 = vmul.f32 1.442695, %v1137_v2  ;;  %v3385_v8 = vadd.f32 %v3335_v39, %v1084_v6 }
 0x2b5   : > { %v1140_v10 = vmul.f32 0.5, %v3382_v5  ;;  %v2202_v11 = vsel %vm1344_vm2, %v3382_v5, 0.0 }
 0x2b6   : > { %2927 = vpow2.f32 %v1157_v7  ;;  %2234 = vst [vmem:[%s3346_s19 + $0x78] sm:$0xff] %v2202_v11  ;;  %v1139_v12 = vmul.f32 0.5, %v3385_v8  ;;  %v2201_v13 = vsel %vm1344_vm2, %v3385_v8, 0.0  ;;  %v2680_v14 = vpop.f32.mrb[18].mxu1 }
 0x2b7   : > { %2233 = vst [vmem:[%s3346_s19 + $0x68] sm:$0xff] %v2201_v13  ;;  %v3396_v31 = vadd.f32 %v2680_v14, %v3335_v39  ;;  %v1094_v32 = vpop.f32.mrb[19].mxu1  ;;  %2929 = vpow2.f32 %v1159_v9  ;;  %v1163_v37 = vmul.f32 1.442695, %v1140_v10 }
 0x2b8   : > { %v2920_v33 = vpop.eup %2919  ;;  %v1161_v35 = vmul.f32 1.442695, %v1139_v12  ;;  %v3399_v36 = vadd.f32 %v3335_v39, %v1094_v32 }
 0x2b9   : > { %v1142_v38 = vmul.f32 0.5, %v3396_v31  ;;  %v2204_v40 = vsel %vm1344_vm2, %v3396_v31, 0.0  ;;  %1197 = vrot.lane.b32.xlu0 %v2920_v33, %s3015_s24  ;;  %v2922_v45 = vpop.eup %2921 }
 0x2ba   : > { %2931 = vpow2.f32 %v1161_v35  ;;  %2236 = vst [vmem:[%s3346_s19 + $0x98] sm:$0xff] %v2204_v40  ;;  %v1141_v41 = vmul.f32 0.5, %v3399_v36  ;;  %v2203_v43 = vsel %vm1344_vm2, %v3399_v36, 0.0  ;;  %v2683_v34 = vpop.f32.mrb[20].mxu1 }
 0x2bb   : > { %2235 = vst [vmem:[%s3346_s19 + $0x88] sm:$0xff] %v2203_v43  ;;  %v3411_v46 = vadd.f32 %v2683_v34, %v3335_v39  ;;  %v1104_v47 = vpop.f32.mrb[21].mxu1  ;;  %2933 = vpow2.f32 %v1163_v37  ;;  %v1167_v53 = vmul.f32 1.442695, %v1142_v38 }
 0x2bc   : > { %v2924_v48 = vpop.eup %2923  ;;  %v1165_v50 = vmul.f32 1.442695, %v1141_v41  ;;  %v3414_v51 = vadd.f32 %v3335_v39, %v1104_v47 }
 0x2bd   : > { %v1144_v54 = vmul.f32 0.5, %v3411_v46  ;;  %v2206_v55 = vsel %vm1344_vm2, %v3411_v46, 0.0  ;;  %1201 = vrot.lane.b32.xlu1 %v2924_v48, %s3015_s24  ;;  %1199 = vrot.lane.b32.xlu0 %v2922_v45, %s3015_s24  ;;  %v2926_v60 = vpop.eup %2925 }
 0x2be   : > { %2935 = vpow2.f32 %v1165_v50  ;;  %2238 = vst [vmem:[%s3346_s19 + $0xb8] sm:$0xff] %v2206_v55  ;;  %v1143_v56 = vmul.f32 0.5, %v3414_v51  ;;  %v2205_v57 = vsel %vm1344_vm2, %v3414_v51, 0.0  ;;  %v2686_v58 = vpop.f32.mrb[22].mxu1  ;;  %v1342_v50 = vld [vmem:[%s3745_s8] sm:$0xff] }
 0x2bf   : > { %2237 = vst [vmem:[%s3346_s19 + $0xa8] sm:$0xff] %v2205_v57  ;;  %v3427_v61 = vadd.f32 %v2686_v58, %v3335_v39  ;;  %v1114_v63 = vpop.f32.mrb[23].mxu1  ;;  %2937 = vpow2.f32 %v1167_v53  ;;  %v1171_v3 = vmul.f32 1.442695, %v1144_v54  ;;  %v1343_v53 = vld [vmem:[%s3745_s8 + $0x8] sm:$0xff]  ;;  %v1341_v57 = vld [vmem:[%s3744_s7] sm:$0xff] }
 0x2c0   : > { %v2928_v0 = vpop.eup %2927  ;;  %v1169_v1 = vmul.f32 1.442695, %v1143_v56  ;;  %v3430_v2 = vadd.f32 %v3335_v39, %v1114_v63  ;;  %v2836_v55 = vpack.c.bf16 %v1343_v53, %v1342_v50 }
 0x2c1   : > { %v1146_v4 = vmul.f32 0.5, %v3427_v61  ;;  %v2208_v6 = vsel %vm1344_vm2, %v3427_v61, 0.0  ;;  %1203 = vrot.lane.b32.xlu1 %v2926_v60, %s3015_s24  ;;  %1205 = vrot.lane.b32.xlu0 %v2928_v0, %s3015_s24  ;;  %v2930_v11 = vpop.eup %2929 }
 0x2c2   : > { %2939 = vpow2.f32 %v1169_v1  ;;  %2240 = vst [vmem:[%s3346_s19 + $0xd8] sm:$0xff] %v2208_v6  ;;  %v1145_v7 = vmul.f32 0.5, %v3430_v2  ;;  %v2207_v9 = vsel %vm1344_vm2, %v3430_v2, 0.0  ;;  %v2689_v10 = vpop.f32.mrb[24].mxu1  ;;  %2837 = vmatprep.subr.bf16.mxu0 %v2836_v55 }
 0x2c3   : > { %2239 = vst [vmem:[%s3346_s19 + $0xc8] sm:$0xff] %v2207_v9  ;;  %v3443_v12 = vadd.f32 %v2689_v10, %v3335_v39  ;;  %v1124_v13 = vpop.f32.mrb[25].mxu1  ;;  %2941 = vpow2.f32 %v1171_v3  ;;  %v1175_v35 = vmul.f32 1.442695, %v1146_v4  ;;  %2839 = vmatpush3.bf16.msra.mxu0 %v2836_v55 }
 0x2c4   : > { %v2932_v14 = vpop.eup %2931  ;;  %v1173_v32 = vmul.f32 1.442695, %v1145_v7  ;;  %v3446_v33 = vadd.f32 %v3335_v39, %v1124_v13  ;;  %2718 = vmatprep.subr.mxu0 %v1341_v57 }
 0x2c5   : > { %v2210_v37 = vsel %vm1344_vm2, %v3443_v12, 0.0  ;;  %1207 = vrot.lane.b32.xlu1 %v2930_v11, %s3015_s24  ;;  %1209 = vrot.lane.b32.xlu0 %v2932_v14, %s3015_s24  ;;  %v1148_v38 = vmul.f32 0.5, %v3443_v12  ;;  %v2934_v39 = vpop.eup %2933 }
 0x2c6   : > { %2943 = vpow2.f32 %v1173_v32  ;;  %2242 = vst [vmem:[%s3346_s19 + $0xf8] sm:$0xff] %v2210_v37  ;;  %v1147_v40 = vmul.f32 0.5, %v3446_v33  ;;  %v2209_v41 = vsel %vm1344_vm2, %v3446_v33, 0.0  ;;  %2695 = vmatmul.mubr.msk.f32.vlgmr.msra.gmra.mrb[22].mxu0 %vm1344_vm2, %v3185_v16 }
 0x2c7   : > { %2241 = vst [vmem:[%s3346_s19 + $0xe8] sm:$0xff] %v2209_v41  ;;  %2945 = vpow2.f32 %v1175_v35  ;;  %v1179_v45 = vmul.f32 1.442695, %v1148_v38  ;;  %2719 = vmatpush3.msra.mxu0 %v1341_v57  ;;  %2697 = vmatprep.mubr.msk.f32.mxu0 %vm1344_vm2, %v3188_v17 }
 0x2c8   : > { %v2936_v43 = vpop.eup %2935  ;;  %v1177_v34 = vmul.f32 1.442695, %v1147_v40 }
 0x2c9   : > { %1211 = vrot.lane.b32.xlu1 %v2934_v39, %s3015_s24  ;;  %1213 = vrot.lane.b32.xlu0 %v2936_v43, %s3015_s24  ;;  %v2938_v47 = vpop.eup %2937 }
 0x2ca   : > { %2947 = vpow2.f32 %v1177_v34  ;;  %2698 = vmatmul.mubr.msk.f32.gmra.mrb[24].mxu0 %vm1344_vm2, %v3195_v18  ;;  %v1758_v34 = vld [vmem:[%s3747_s10 + $0x18] sm:$0xff] }
 0x2cb   : > { %2949 = vpow2.f32 %v1179_v45  ;;  %2700 = vmatprep.mubr.msk.f32.mxu0 %vm1344_vm2, %v3198_v19 }
 0x2cc   : > { %v2940_v48 = vpop.eup %2939 }
 0x2cd   : > { %1215 = vrot.lane.b32.xlu1 %v2938_v47, %s3015_s24  ;;  %1217 = vrot.lane.b32.xlu0 %v2940_v48, %s3015_s24  ;;  %v2942_v54 = vpop.eup %2941 }
 0x2ce   : > { %2701 = vmatmul.mubr.msk.f32.gmra.mrb[26].mxu0 %vm1344_vm2, %v3205_v20 }
 0x2cf   : > { %2703 = vmatprep.mubr.msk.f32.mxu0 %vm1344_vm2, %v3208_v21 }
 0x2d0   : > { %v2944_v56 = vpop.eup %2943 }
 0x2d1   : > { %1219 = vrot.lane.b32.xlu1 %v2942_v54, %s3015_s24  ;;  %1221 = vrot.lane.b32.xlu0 %v2944_v56, %s3015_s24  ;;  %v2946_v58 = vpop.eup %2945 }
 0x2d2   : > { %2704 = vmatmul.mubr.msk.f32.gmra.mrb[28].mxu0 %vm1344_vm2, %v3215_v22 }
 0x2d3   : > { %2706 = vmatprep.mubr.msk.f32.mxu0 %vm1344_vm2, %v3218_v23 }
 0x2d4   : > { %v2948_v60 = vpop.eup %2947 }
 0x2d5   : > { %1223 = vrot.lane.b32.xlu1 %v2946_v58, %s3015_s24  ;;  %1225 = vrot.lane.b32.xlu0 %v2948_v60, %s3015_s24  ;;  %v2950_v63 = vpop.eup %2949 }
 0x2d6   : > { %2707 = vmatmul.mubr.msk.f32.gmra.mrb[30].mxu0 %vm1344_vm2, %v3225_v24 }
 0x2d7   : > { %2709 = vmatprep.mubr.msk.f32.mxu0 %vm1344_vm2, %v3228_v25 }
 0x2d9   : > { %1227 = vrot.lane.b32.xlu1 %v2950_v63, %s3015_s24  ;;  %s3017_s24 = smov [#allocation2]  }
 0x2da   : > { %2710 = vmatmul.mubr.msk.f32.gmra.mrb[32].mxu0 %vm1344_vm2, %v3235_v26  ;;  %s2955_s25 = sshll.u32 %s3017_s24, 4  ;;  %s2956_s25 = int_to_ptr.vmem [resolvable:$false] %s2955_s25 }
 0x2db   : > { %2712 = vmatprep.mubr.msk.f32.mxu0 %vm1344_vm2, %v3238_v27  ;;  %s2957_s26 = scalar_lea.vmem %s2956_s25, 8192  ;;  %p2958_p0 = scmp.lt.s32.totalorder %s3688_s28, %s2956_s25 }
 0x2dc   : > { %p2959_p1 = scmp.lt.s32.totalorder %s2957_s26, %s2951_s22 }
 0x2de   : > { %2713 = vmatmul.mubr.msk.f32.gmra.mrb[34].mxu0 %vm1344_vm2, %v3245_v28  ;;  %p2960_p2 = por %p2959_p1, %p2958_p0 }
 0x2df   : > { %2715 = vmatprep.mubr.msk.f32.mxu0 %vm1344_vm2, %v3248_v29 }
 0x2e0   : > { %p2961_p3 = pnand %p2960_p2, %p2954_p13 }
 0x2e2   : > { %2716 = vmatmul.mubr.msk.f32.gmra.mrb[36].mxu0 %vm1344_vm2, %v3255_v30 }
 0x32b   : > { %v1198_v0 = vpop.permute.xlu0 %1197 }
 0x32c   : > { %v1245_v1 = vmul.f32 %v1198_v0, %v3180_v15 }
 0x32e   : > { %1277 = vrot.lane.b32.xlu0 %v1245_v1, %s3016_s15 }
 0x32f   : > { %v1202_v3 = vpop.permute.xlu1 %1201  ;;  %v1200_v4 = vpop.permute.xlu0 %1199 }
 0x330   : > { %v1247_v6 = vmul.f32 %v1202_v3, %v3188_v17  ;;  %v1246_v7 = vmul.f32 %v1200_v4, %v3185_v16 }
 0x332   : > { %1281 = vrot.lane.b32.xlu0 %v1247_v6, %s3016_s15  ;;  %1279 = vrot.lane.b32.xlu1 %v1246_v7, %s3016_s15 }
 0x333   : > { %v1204_v9 = vpop.permute.xlu1 %1203  ;;  %v1206_v10 = vpop.permute.xlu0 %1205 }
 0x334   : > { %v1248_v11 = vmul.f32 %v1204_v9, %v3195_v18  ;;  %v1249_v13 = vmul.f32 %v1206_v10, %v3198_v19 }
 0x336   : > { %1283 = vrot.lane.b32.xlu1 %v1248_v11, %s3016_s15  ;;  %1285 = vrot.lane.b32.xlu0 %v1249_v13, %s3016_s15 }
 0x337   : > { %v1208_v15 = vpop.permute.xlu1 %1207  ;;  %v1210_v14 = vpop.permute.xlu0 %1209 }
 0x338   : > { %v1250_v17 = vmul.f32 %v1208_v15, %v3205_v20  ;;  %v1251_v16 = vmul.f32 %v1210_v14, %v3208_v21 }
 0x33a   : > { %1287 = vrot.lane.b32.xlu1 %v1250_v17, %s3016_s15  ;;  %1289 = vrot.lane.b32.xlu0 %v1251_v16, %s3016_s15 }
 0x33b   : > { %v1212_v32 = vpop.permute.xlu1 %1211  ;;  %v1214_v35 = vpop.permute.xlu0 %1213 }
 0x33c   : > { %v1252_v18 = vmul.f32 %v1212_v32, %v3215_v22  ;;  %v1253_v19 = vmul.f32 %v1214_v35, %v3218_v23  ;;  %v1755_v22 = vld [vmem:[%s3747_s10] sm:$0xff]  ;;  %v1756_v23 = vld [vmem:[%s3747_s10 + $0x8] sm:$0xff]  ;;  %v1977_v32 = vld [vmem:[%s3749_s12 + $0x10] sm:$0xff] }
 0x33d   : > { %v2840_v43 = vpack.c.bf16 %v1756_v23, %v1755_v22  ;;  %v1978_v35 = vld [vmem:[%s3749_s12 + $0x18] sm:$0xff] }
 0x33e   : > { %1291 = vrot.lane.b32.xlu1 %v1252_v18, %s3016_s15  ;;  %1293 = vrot.lane.b32.xlu0 %v1253_v19, %s3016_s15 }
 0x33f   : > { %v1216_v37 = vpop.permute.xlu1 %1215  ;;  %v1218_v38 = vpop.permute.xlu0 %1217  ;;  %2841 = vmatprep.subr.bf16.mxu1 %v2840_v43 }
 0x340   : > { %v1254_v20 = vmul.f32 %v1216_v37, %v3225_v24  ;;  %v1255_v21 = vmul.f32 %v1218_v38, %v3228_v25  ;;  %v1757_v24 = vld [vmem:[%s3747_s10 + $0x10] sm:$0xff]  ;;  %2843 = vmatpush3.bf16.msra.mxu1 %v2840_v43 }
 0x341   : > { %v2844_v45 = vpack.c.bf16 %v1758_v34, %v1757_v24 }
 0x342   : > { %1295 = vrot.lane.b32.xlu1 %v1254_v20, %s3016_s15  ;;  %1297 = vrot.lane.b32.xlu0 %v1255_v21, %s3016_s15  ;;  %v2852_v21 = vpack.c.bf16 %v1978_v35, %v1977_v32 }
 0x343   : > { %v1220_v40 = vpop.permute.xlu1 %1219  ;;  %v1222_v41 = vpop.permute.xlu0 %1221  ;;  %2845 = vmatprep.subr.bf16.mxu1 %v2844_v45 }
 0x344   : > { %v1256_v25 = vmul.f32 %v1220_v40, %v3235_v26  ;;  %v1257_v39 = vmul.f32 %v1222_v41, %v3238_v27  ;;  %2847 = vmatpush3.bf16.msra.mxu1 %v2844_v45 }
 0x346   : > { %1299 = vrot.lane.b32.xlu1 %v1256_v25, %s3016_s15  ;;  %1301 = vrot.lane.b32.xlu0 %v1257_v39, %s3016_s15 }
 0x347   : > { %v1224_v47 = vpop.permute.xlu1 %1223  ;;  %v1226_v48 = vpop.permute.xlu0 %1225 }
 0x348   : > { %v1258_v50 = vmul.f32 %v1224_v47, %v3245_v28  ;;  %v1259_v53 = vmul.f32 %v1226_v48, %v3248_v29 }
 0x34a   : > { %1303 = vrot.lane.b32.xlu1 %v1258_v50, %s3016_s15  ;;  %1305 = vrot.lane.b32.xlu0 %v1259_v53, %s3016_s15 }
 0x34b   : > { %v1228_v26 = vpop.permute.xlu1 %1227 }
 0x34c   : > { %v1260_v27 = vmul.f32 %v1228_v26, %v3255_v30 }
 0x34e   : > { %1307 = vrot.lane.b32.xlu1 %v1260_v27, %s3016_s15  ;;  %s3686_s15 = scalar_lea.hbm %s3751_s14, %s2452_s27 }
 0x3a0   : > { %v1278_v54 = vpop.permute.xlu0 %1277 }
 0x3a1   : > { %v1325_v55 = vadd.f32 %v1278_v54, %v3341_v44 }
 0x3a3   : > { %2720 = vmatprep.mubr.msk.f32.mxu0 %vm1522_vm3, %v1325_v55 }
 0x3a4   : > { %v1280_v28 = vpop.permute.xlu1 %1279  ;;  %v1282_v29 = vpop.permute.xlu0 %1281 }
 0x3a5   : > { %v1326_v56 = vadd.f32 %v1280_v28, %v3338_v42  ;;  %v1327_v57 = vadd.f32 %v1282_v29, %v3357_v52 }
 0x3a7   : > { %2721 = vmatmul.mubr.msk.f32.vlgmr.msra.gmra.mrb[22].mxu0 %vm1522_vm3, %v1326_v56 }
 0x3a8   : > { %v1284_v58 = vpop.permute.xlu1 %1283  ;;  %2723 = vmatprep.mubr.msk.f32.mxu0 %vm1522_vm3, %v1327_v57  ;;  %v1286_v30 = vpop.permute.xlu0 %1285 }
 0x3a9   : > { %v1328_v60 = vadd.f32 %v1284_v58, %v3354_v49  ;;  %v1329_v63 = vadd.f32 %v1286_v30, %v3371_v62 }
 0x3ab   : > { %2724 = vmatmul.mubr.msk.f32.gmra.mrb[24].mxu0 %vm1522_vm3, %v1328_v60 }
 0x3ac   : > { %v1288_v44 = vpop.permute.xlu1 %1287  ;;  %2726 = vmatprep.mubr.msk.f32.mxu0 %vm1522_vm3, %v1329_v63  ;;  %v1290_v0 = vpop.permute.xlu0 %1289 }
 0x3ad   : > { %v1330_v42 = vadd.f32 %v1288_v44, %v3368_v59  ;;  %v1331_v52 = vadd.f32 %v1290_v0, %v3385_v8 }
 0x3af   : > { %2727 = vmatmul.mubr.msk.f32.gmra.mrb[26].mxu0 %vm1522_vm3, %v1330_v42 }
 0x3b0   : > { %v1292_v1 = vpop.permute.xlu1 %1291  ;;  %2729 = vmatprep.mubr.msk.f32.mxu0 %vm1522_vm3, %v1331_v52  ;;  %v1294_v3 = vpop.permute.xlu0 %1293 }
 0x3b1   : > { %v1332_v49 = vadd.f32 %v1292_v1, %v3382_v5  ;;  %v1333_v62 = vadd.f32 %v1294_v3, %v3399_v36 }
 0x3b3   : > { %2730 = vmatmul.mubr.msk.f32.gmra.mrb[28].mxu0 %vm1522_vm3, %v1332_v49 }
 0x3b4   : > { %v1296_v4 = vpop.permute.xlu1 %1295  ;;  %2732 = vmatprep.mubr.msk.f32.mxu0 %vm1522_vm3, %v1333_v62  ;;  %v1298_v6 = vpop.permute.xlu0 %1297 }
 0x3b5   : > { %v1334_v59 = vadd.f32 %v1296_v4, %v3396_v31  ;;  %v1335_v8 = vadd.f32 %v1298_v6, %v3414_v51 }
 0x3b7   : > { %2733 = vmatmul.mubr.msk.f32.gmra.mrb[30].mxu0 %vm1522_vm3, %v1334_v59 }
 0x3b8   : > { %v1300_v7 = vpop.permute.xlu1 %1299  ;;  %2735 = vmatprep.mubr.msk.f32.mxu0 %vm1522_vm3, %v1335_v8  ;;  %v1302_v9 = vpop.permute.xlu0 %1301 }
 0x3b9   : > { %v1336_v5 = vadd.f32 %v1300_v7, %v3411_v46  ;;  %v1337_v36 = vadd.f32 %v1302_v9, %v3430_v2  ;;  %v1975_v46 = vld [vmem:[%s3749_s12] sm:$0xff]  ;;  %v1976_v2 = vld [vmem:[%s3749_s12 + $0x8] sm:$0xff] }
 0x3ba   : > { %v2411_v9 = vld [vmem:[%s3748_s11] ss:$0 sm:$0xff] }
 0x3bb   : > { %2736 = vmatmul.mubr.msk.f32.gmra.mrb[32].mxu0 %vm1522_vm3, %v1336_v5 }
 0x3bc   : > { %v1304_v10 = vpop.permute.xlu1 %1303  ;;  %2738 = vmatprep.mubr.msk.f32.mxu0 %vm1522_vm3, %v1337_v36  ;;  %v1306_v11 = vpop.permute.xlu0 %1305 }
 0x3bd   : > { %v1338_v31 = vadd.f32 %v1304_v10, %v3427_v61  ;;  %v1339_v51 = vadd.f32 %v1306_v11, %v3446_v33  ;;  %v2848_v61 = vpack.c.bf16 %v1976_v2, %v1975_v46  ;;  %v3591_v33 = vld [vmem:[%s3746_s9] ss:$0 sm:$0xff] }
 0x3bf   : > { %2739 = vmatmul.mubr.msk.f32.gmra.mrb[34].mxu0 %vm1522_vm3, %v1338_v31  ;;  %2849 = vmatprep.subr.bf16.mxu1 %v2848_v61 }
 0x3c0   : > { %v1308_v13 = vpop.permute.xlu1 %1307  ;;  %2741 = vmatprep.mubr.msk.f32.mxu0 %vm1522_vm3, %v1339_v51 }
 0x3c1   : > { %v1340_v15 = vadd.f32 %v1308_v13, %v3443_v12 }
 0x3c3   : > { %2742 = vmatmul.mubr.msk.f32.gmra.mrb[36].mxu0 %vm1522_vm3, %v1340_v15 }
 0x47a   : > { %v2722_v14 = vpop.f32.mrb[22].mxu0 }
 0x47b   : > { %v1724_v12 = vadd.f32 %v2722_v14, %v3591_v33  ;;  %v1637_v17 = vpop.f32.mrb[23].mxu0 }
 0x47c   : > { %v1723_v16 = vadd.f32 %v3591_v33, %v1637_v17 }
 0x47d   : > { %v1740_v37 = vmax.f32 %v1724_v12, 0.0 }
 0x47e   : > { %v1739_v18 = vmax.f32 %v1723_v16, 0.0  ;;  %v2725_v19 = vpop.f32.mrb[24].mxu0 }
 0x47f   : > { %v1726_v38 = vadd.f32 %v2725_v19, %v3591_v33  ;;  %v1647_v20 = vpop.f32.mrb[25].mxu0 }
 0x480   : > { %v1725_v40 = vadd.f32 %v3591_v33, %v1647_v20  ;;  %2752 = vmatprep.mubr.msk.f32.mxu1 %vm719_vm1, %v1739_v18 }
 0x481   : > { %2753 = vmatmul.mubr.msk.f32.vlgmr.msra.gmra.mrb[26].mxu1 %vm719_vm1, %v1740_v37  ;;  %v1742_v23 = vmax.f32 %v1726_v38, 0.0 }
 0x482   : > { %v1741_v41 = vmax.f32 %v1725_v40, 0.0  ;;  %v2728_v22 = vpop.f32.mrb[26].mxu0  ;;  %2851 = vmatpush3.bf16.msra.mxu1 %v2848_v61 }
 0x483   : > { %v1728_v24 = vadd.f32 %v2728_v22, %v3591_v33  ;;  %v1657_v25 = vpop.f32.mrb[27].mxu0  ;;  %2853 = vmatprep.subr.bf16.mxu1 %v2852_v21 }
 0x484   : > { %v1727_v39 = vadd.f32 %v3591_v33, %v1657_v25  ;;  %2755 = vmatprep.mubr.msk.f32.mxu1 %vm719_vm1, %v1741_v41 }
 0x485   : > { %2756 = vmatmul.mubr.msk.f32.gmra.mrb[28].mxu1 %vm719_vm1, %v1742_v23  ;;  %v1744_v45 = vmax.f32 %v1728_v24, 0.0 }
 0x486   : > { %v1743_v43 = vmax.f32 %v1727_v39, 0.0  ;;  %v2731_v34 = vpop.f32.mrb[28].mxu0  ;;  %2855 = vmatpush3.bf16.msra.mxu1 %v2852_v21 }
 0x487   : > { %v1730_v47 = vadd.f32 %v2731_v34, %v3591_v33  ;;  %v1667_v48 = vpop.f32.mrb[29].mxu0 }
 0x488   : > { %v1729_v50 = vadd.f32 %v3591_v33, %v1667_v48  ;;  %2758 = vmatprep.mubr.msk.f32.mxu1 %vm719_vm1, %v1743_v43 }
 0x489   : > { %2759 = vmatmul.mubr.msk.f32.gmra.mrb[30].mxu1 %vm719_vm1, %v1744_v45  ;;  %v1746_v27 = vmax.f32 %v1730_v47, 0.0 }
 0x48a   : > { %v1745_v53 = vmax.f32 %v1729_v50, 0.0  ;;  %v2734_v26 = vpop.f32.mrb[30].mxu0 }
 0x48b   : > { %v1732_v54 = vadd.f32 %v2734_v26, %v3591_v33  ;;  %v1677_v55 = vpop.f32.mrb[31].mxu0 }
 0x48c   : > { %v1731_v28 = vadd.f32 %v3591_v33, %v1677_v55  ;;  %2761 = vmatprep.mubr.msk.f32.mxu1 %vm719_vm1, %v1745_v53 }
 0x48d   : > { %2762 = vmatmul.mubr.msk.f32.gmra.mrb[32].mxu1 %vm719_vm1, %v1746_v27  ;;  %v1748_v57 = vmax.f32 %v1732_v54, 0.0 }
 0x48e   : > { %v1747_v29 = vmax.f32 %v1731_v28, 0.0  ;;  %v2737_v56 = vpop.f32.mrb[32].mxu0 }
 0x48f   : > { %v1734_v58 = vadd.f32 %v2737_v56, %v3591_v33  ;;  %v1687_v30 = vpop.f32.mrb[33].mxu0 }
 0x490   : > { %v1733_v60 = vadd.f32 %v3591_v33, %v1687_v30  ;;  %2764 = vmatprep.mubr.msk.f32.mxu1 %vm719_vm1, %v1747_v29 }
 0x491   : > { %2765 = vmatmul.mubr.msk.f32.gmra.mrb[34].mxu1 %vm719_vm1, %v1748_v57  ;;  %v1750_v0 = vmax.f32 %v1734_v58, 0.0 }
 0x492   : > { %v1749_v63 = vmax.f32 %v1733_v60, 0.0  ;;  %v2740_v44 = vpop.f32.mrb[34].mxu0  ;;  %v2428_v60 = vld [vmem:[%s3750_s13] ss:$0 sm:$0xff] }
 0x493   : > { %v1736_v42 = vadd.f32 %v2740_v44, %v3591_v33  ;;  %v1697_v52 = vpop.f32.mrb[35].mxu0 }
 0x494   : > { %v1735_v1 = vadd.f32 %v3591_v33, %v1697_v52  ;;  %2767 = vmatprep.mubr.msk.f32.mxu1 %vm719_vm1, %v1749_v63 }
 0x495   : > { %2768 = vmatmul.mubr.msk.f32.gmra.mrb[36].mxu1 %vm719_vm1, %v1750_v0  ;;  %v1752_v62 = vmax.f32 %v1736_v42, 0.0 }
 0x496   : > { %v1751_v3 = vmax.f32 %v1735_v1, 0.0  ;;  %v2743_v49 = vpop.f32.mrb[36].mxu0 }
 0x497   : > { %v1738_v4 = vadd.f32 %v2743_v49, %v3591_v33  ;;  %v1707_v6 = vpop.f32.mrb[37].mxu0 }
 0x498   : > { %v1737_v59 = vadd.f32 %v3591_v33, %v1707_v6  ;;  %2770 = vmatprep.mubr.msk.f32.mxu1 %vm719_vm1, %v1751_v3 }
 0x499   : > { %2771 = vmatmul.mubr.msk.f32.gmra.mrb[38].mxu1 %vm719_vm1, %v1752_v62  ;;  %v1754_v7 = vmax.f32 %v1738_v4, 0.0 }
 0x49a   : > { %v1753_v8 = vmax.f32 %v1737_v59, 0.0 }
 0x49c   : > { %2773 = vmatprep.mubr.msk.f32.mxu1 %vm719_vm1, %v1753_v8 }
 0x49d   : > { %2774 = vmatmul.mubr.msk.f32.gmra.mrb[40].mxu1 %vm719_vm1, %v1754_v7 }
 0x554   : > { %v2754_v5 = vpop.f32.mrb[26].mxu1 }
 0x555   : > { %v1886_v36 = vadd.f32 %v2754_v5, %v2411_v9  ;;  %v1880_v10 = vpop.f32.mrb[27].mxu1 }
 0x556   : > { %v1881_v11 = vadd.f32 %v2411_v9, %v1880_v10 }
 0x557   : > { %v1960_v13 = vmax.f32 %v1886_v36, 0.0 }
 0x558   : > { %v1959_v31 = vmax.f32 %v1881_v11, 0.0  ;;  %v2757_v51 = vpop.f32.mrb[28].mxu1 }
 0x559   : > { %v1896_v15 = vadd.f32 %v2757_v51, %v2411_v9  ;;  %v1890_v46 = vpop.f32.mrb[29].mxu1 }
 0x55a   : > { %v1891_v2 = vadd.f32 %v2411_v9, %v1890_v46  ;;  %2784 = vmatprep.mubr.msk.f32.mxu1 %vm719_vm1, %v1959_v31 }
 0x55b   : > { %2785 = vmatmul.mubr.msk.f32.vlgmr.msra.gmra.mrb[42].mxu1 %vm719_vm1, %v1960_v13  ;;  %v1962_v14 = vmax.f32 %v1896_v15, 0.0 }
 0x55c   : > { %v1961_v61 = vmax.f32 %v1891_v2, 0.0  ;;  %v2760_v33 = vpop.f32.mrb[30].mxu1 }
 0x55d   : > { %v1906_v12 = vadd.f32 %v2760_v33, %v2411_v9  ;;  %v1900_v17 = vpop.f32.mrb[31].mxu1 }
 0x55e   : > { %v1901_v16 = vadd.f32 %v2411_v9, %v1900_v17  ;;  %2787 = vmatprep.mubr.msk.f32.mxu1 %vm719_vm1, %v1961_v61 }
 0x55f   : > { %2788 = vmatmul.mubr.msk.f32.gmra.mrb[44].mxu1 %vm719_vm1, %v1962_v14  ;;  %v1964_v18 = vmax.f32 %v1906_v12, 0.0 }
 0x560   : > { %v1963_v32 = vmax.f32 %v1901_v16, 0.0  ;;  %v2763_v35 = vpop.f32.mrb[32].mxu1 }
 0x561   : > { %v1916_v19 = vadd.f32 %v2763_v35, %v2411_v9  ;;  %v1910_v37 = vpop.f32.mrb[33].mxu1 }
 0x562   : > { %v1911_v38 = vadd.f32 %v2411_v9, %v1910_v37  ;;  %2790 = vmatprep.mubr.msk.f32.mxu1 %vm719_vm1, %v1963_v32 }
 0x563   : > { %2791 = vmatmul.mubr.msk.f32.gmra.mrb[46].mxu1 %vm719_vm1, %v1964_v18  ;;  %v1966_v40 = vmax.f32 %v1916_v19, 0.0 }
 0x564   : > { %v1965_v20 = vmax.f32 %v1911_v38, 0.0  ;;  %v2766_v21 = vpop.f32.mrb[34].mxu1 }
 0x565   : > { %v1926_v41 = vadd.f32 %v2766_v21, %v2411_v9  ;;  %v1920_v22 = vpop.f32.mrb[35].mxu1 }
 0x566   : > { %v1921_v23 = vadd.f32 %v2411_v9, %v1920_v22  ;;  %2793 = vmatprep.mubr.msk.f32.mxu1 %vm719_vm1, %v1965_v20 }
 0x567   : > { %2794 = vmatmul.mubr.msk.f32.gmra.mrb[48].mxu1 %vm719_vm1, %v1966_v40  ;;  %v1968_v39 = vmax.f32 %v1926_v41, 0.0 }
 0x568   : > { %v1967_v24 = vmax.f32 %v1921_v23, 0.0  ;;  %v2769_v25 = vpop.f32.mrb[36].mxu1 }
 0x569   : > { %v1936_v43 = vadd.f32 %v2769_v25, %v2411_v9  ;;  %v1930_v34 = vpop.f32.mrb[37].mxu1 }
 0x56a   : > { %v1931_v45 = vadd.f32 %v2411_v9, %v1930_v34  ;;  %2796 = vmatprep.mubr.msk.f32.mxu1 %vm719_vm1, %v1967_v24 }
 0x56b   : > { %2797 = vmatmul.mubr.msk.f32.gmra.mrb[50].mxu1 %vm719_vm1, %v1968_v39  ;;  %v1970_v50 = vmax.f32 %v1936_v43, 0.0 }
 0x56c   : > { %v1969_v47 = vmax.f32 %v1931_v45, 0.0  ;;  %v2772_v48 = vpop.f32.mrb[38].mxu1 }
 0x56d   : > { %v1946_v53 = vadd.f32 %v2772_v48, %v2411_v9  ;;  %v1940_v26 = vpop.f32.mrb[39].mxu1 }
 0x56e   : > { %v1941_v27 = vadd.f32 %v2411_v9, %v1940_v26  ;;  %2799 = vmatprep.mubr.msk.f32.mxu1 %vm719_vm1, %v1969_v47 }
 0x56f   : > { %2800 = vmatmul.mubr.msk.f32.gmra.mrb[52].mxu1 %vm719_vm1, %v1970_v50  ;;  %v1972_v28 = vmax.f32 %v1946_v53, 0.0 }
 0x570   : > { %v1971_v54 = vmax.f32 %v1941_v27, 0.0  ;;  %v2775_v55 = vpop.f32.mrb[40].mxu1 }
 0x571   : > { %v1956_v29 = vadd.f32 %v2775_v55, %v2411_v9  ;;  %v1950_v56 = vpop.f32.mrb[41].mxu1 }
 0x572   : > { %v1951_v57 = vadd.f32 %v2411_v9, %v1950_v56  ;;  %2802 = vmatprep.mubr.msk.f32.mxu1 %vm719_vm1, %v1971_v54 }
 0x573   : > { %2803 = vmatmul.mubr.msk.f32.gmra.mrb[54].mxu1 %vm719_vm1, %v1972_v28  ;;  %v1974_v30 = vmax.f32 %v1956_v29, 0.0 }
 0x574   : > { %v1973_v58 = vmax.f32 %v1951_v57, 0.0 }
 0x576   : > { %2805 = vmatprep.mubr.msk.f32.mxu1 %vm719_vm1, %v1973_v58 }
 0x577   : > { %2806 = vmatmul.mubr.msk.f32.gmra.mrb[56].mxu1 %vm719_vm1, %v1974_v30 }
 0x62e   : > { %v2786_v63 = vpop.f32.mrb[42].mxu1 }
 0x62f   : > { %v2106_v44 = vadd.f32 %v2786_v63, %v2428_v60  ;;  %v2100_v0 = vpop.f32.mrb[43].mxu1 }
 0x630   : > { %v2101_v42 = vadd.f32 %v2428_v60, %v2100_v0 }
 0x631   : > { %v2180_v52 = vsel %vm719_vm1, %v2106_v44, 0.0 }
 0x632   : > { %2212 = vst [vmem:[%s3346_s19 + $0x10] sm:$0xff] %v2180_v52  ;;  %v2179_v1 = vsel %vm719_vm1, %v2101_v42, 0.0  ;;  %v2789_v3 = vpop.f32.mrb[44].mxu1 }
 0x633   : > { %2211 = vst [vmem:[%s3346_s19] sm:$0xff] %v2179_v1  ;;  %v2116_v49 = vadd.f32 %v2789_v3, %v2428_v60  ;;  %v2110_v62 = vpop.f32.mrb[45].mxu1 }
 0x634   : > { %v2111_v4 = vadd.f32 %v2428_v60, %v2110_v62 }
 0x635   : > { %v2182_v6 = vsel %vm719_vm1, %v2116_v49, 0.0 }
 0x636   : > { %2214 = vst [vmem:[%s3346_s19 + $0x30] sm:$0xff] %v2182_v6  ;;  %v2181_v59 = vsel %vm719_vm1, %v2111_v4, 0.0  ;;  %v2792_v8 = vpop.f32.mrb[46].mxu1 }
 0x637   : > { %2213 = vst [vmem:[%s3346_s19 + $0x20] sm:$0xff] %v2181_v59  ;;  %v2126_v7 = vadd.f32 %v2792_v8, %v2428_v60  ;;  %v2120_v9 = vpop.f32.mrb[47].mxu1 }
 0x638   : > { %v2121_v5 = vadd.f32 %v2428_v60, %v2120_v9 }
 0x639   : > { %v2184_v36 = vsel %vm719_vm1, %v2126_v7, 0.0 }
 0x63a   : > { %2216 = vst [vmem:[%s3346_s19 + $0x50] sm:$0xff] %v2184_v36  ;;  %v2183_v10 = vsel %vm719_vm1, %v2121_v5, 0.0  ;;  %v2795_v11 = vpop.f32.mrb[48].mxu1 }
 0x63b   : > { %2215 = vst [vmem:[%s3346_s19 + $0x40] sm:$0xff] %v2183_v10  ;;  %v2136_v31 = vadd.f32 %v2795_v11, %v2428_v60  ;;  %v2130_v51 = vpop.f32.mrb[49].mxu1 }
 0x63c   : > { %v2131_v13 = vadd.f32 %v2428_v60, %v2130_v51 }
 0x63d   : > { %v2186_v15 = vsel %vm719_vm1, %v2136_v31, 0.0 }
 0x63e   : > { %2218 = vst [vmem:[%s3346_s19 + $0x70] sm:$0xff] %v2186_v15  ;;  %v2185_v46 = vsel %vm719_vm1, %v2131_v13, 0.0  ;;  %v2798_v2 = vpop.f32.mrb[50].mxu1 }
 0x63f   : > { %2217 = vst [vmem:[%s3346_s19 + $0x60] sm:$0xff] %v2185_v46  ;;  %v2146_v61 = vadd.f32 %v2798_v2, %v2428_v60  ;;  %v2140_v33 = vpop.f32.mrb[51].mxu1 }
 0x640   : > { %v2141_v14 = vadd.f32 %v2428_v60, %v2140_v33 }
 0x641   : > { %v2188_v12 = vsel %vm719_vm1, %v2146_v61, 0.0 }
 0x642   : > { %2220 = vst [vmem:[%s3346_s19 + $0x90] sm:$0xff] %v2188_v12  ;;  %v2187_v17 = vsel %vm719_vm1, %v2141_v14, 0.0  ;;  %v2801_v16 = vpop.f32.mrb[52].mxu1 }
 0x643   : > { %2219 = vst [vmem:[%s3346_s19 + $0x80] sm:$0xff] %v2187_v17  ;;  %v2156_v32 = vadd.f32 %v2801_v16, %v2428_v60  ;;  %v2150_v35 = vpop.f32.mrb[53].mxu1 }
 0x644   : > { %v2151_v18 = vadd.f32 %v2428_v60, %v2150_v35 }
 0x645   : > { %v2190_v19 = vsel %vm719_vm1, %v2156_v32, 0.0 }
 0x646   : > { %2222 = vst [vmem:[%s3346_s19 + $0xb0] sm:$0xff] %v2190_v19  ;;  %v2189_v37 = vsel %vm719_vm1, %v2151_v18, 0.0  ;;  %v2804_v38 = vpop.f32.mrb[54].mxu1 }
 0x647   : > { %2221 = vst [vmem:[%s3346_s19 + $0xa0] sm:$0xff] %v2189_v37  ;;  %v2166_v20 = vadd.f32 %v2804_v38, %v2428_v60  ;;  %v2160_v21 = vpop.f32.mrb[55].mxu1 }
 0x648   : > { %v2161_v40 = vadd.f32 %v2428_v60, %v2160_v21 }
 0x649   : > { %v2192_v41 = vsel %vm719_vm1, %v2166_v20, 0.0 }
 0x64a   : > { %2224 = vst [vmem:[%s3346_s19 + $0xd0] sm:$0xff] %v2192_v41  ;;  %v2191_v22 = vsel %vm719_vm1, %v2161_v40, 0.0  ;;  %v2807_v23 = vpop.f32.mrb[56].mxu1 }
 0x64b   : > { %2223 = vst [vmem:[%s3346_s19 + $0xc0] sm:$0xff] %v2191_v22  ;;  %v2176_v24 = vadd.f32 %v2807_v23, %v2428_v60  ;;  %v2170_v25 = vpop.f32.mrb[57].mxu1 }
 0x64c   : > { %v2171_v39 = vadd.f32 %v2428_v60, %v2170_v25 }
 0x64d   : > { %v2194_v43 = vsel %vm719_vm1, %v2176_v24, 0.0 }
 0x64e   : > { %2226 = vst [vmem:[%s3346_s19 + $0xf0] sm:$0xff] %v2194_v43  ;;  %v2193_v34 = vsel %vm719_vm1, %v2171_v39, 0.0 }
 0x64f   : > { %2225 = vst [vmem:[%s3346_s19 + $0xe0] sm:$0xff] %v2193_v34 }
 0x650   : > { %2964 = shalt.err (!%p2961_p3)
}
 0x651   : > { %s2965_s18 = scalar_lea.hbm %s3686_s15, 4096  ;;  %s2969_s21 = scalar_lea.hbm %s3751_s14, 8192 }
 0x652   : > { %p2966_p4 = scmp.ne.s32.totalorder %s3686_s15, %s2965_s18  ;;  %p2970_p9 = scmp.lt.u32.totalorder %s3686_s15, %s3751_s14 }
 0x653   : > { %p2971_p10 = scmp.lt.u32.totalorder %s2969_s21, %s2965_s18  ;;  %p2973_p12 = scmp.lt.u32.totalorder %s2965_s18, %s3686_s15 }
 0x654   : > { %p2967_p7 = pnand %p2966_p4, %p3133_p5 }
 0x655   : > { %p2972_p11 = por %p2971_p10, %p2970_p9 }
 0x656   : > { %p2968_p8 = pneg %p2967_p7 }
 0x657   : > { %p2974_p13 = por %p2973_p12, %p2972_p11 }
 0x659   : > { %p2975_p0 = pnand %p2974_p13, %p2968_p8 }
 0x65b   : > { %2978 = shalt.err (!%p2975_p0)
}
 0x65c   : > { %s3018_s22 = smov 256   ;;  %s3019_s25 = smov 16  }
 0x65d   : > { %2876 = dma.vmem_to_hbm [thread:$0]  (%p3133_p5), %s3688_s28, 4096, %s3686_s15, %s3696_s17, %s3018_s22, %s3018_s22, %s3019_s25  }
 0x65e PF: > { %p2882_p1 = scmp.ge.s32.totalorder %s3013_s16, 2  ;;  %s2273_s19 = sand.u32 1, %s3001_s29  }
 0x65f   : > { %s2274_s18 = scalar_lea.sflag [#allocation3], %s2273_s19 }
 0x660   : > { %p2879_p2 = pnand %p2882_p1, %p3137_p6 }
 0x662   : > { %2996 = dma.done.wait (!%p2879_p2), %s2274_s18, 4096  }
 0x663   : > { %2998 = vsyncadd (!%p2879_p2), %s2274_s18, 4294963200  ;;  %s3763_s16 = sld [smem:[#allocation6_spill]]  ;;  %s3764_s27 = sld [smem:[#allocation5_spill]] }
 0x664   : > { %s3765_s15 = sld [smem:[#allocation7_spill]]  ;;  %s3766_s29 = smov %s3005_s30 }
 0x669   : > { %p24_p3 = scmp.ge.s32.totalorder %s3763_s16, 4   ;;  %s3767_s30 = smov %s3764_s27 }
 0x66b   :  { %26 = sbr.rel (!%p24_p3) target bundleno = 3 (0x3), region = 111 }
 0x672   :  { %2279 = vsyncpa [#allocation3], 1 }
 0x673   :  { %2281 = vsyncpa [#allocation3 + $0x1], 1 }

</bundles_post_ra>
